<compile_context>
chip_gen: v5e
topology: v5e:2x2
jax: 0.10.0
libtpu: 0.0.40
codegen_flags: <defaults>
</compile_context>

<pallas_src>
import functools

import numpy as np
import jax
import jax.numpy as jnp
from jax.experimental import pallas as pl
from jax.experimental.pallas import tpu as pltpu

HIGHEST = jax.lax.Precision.HIGHEST  # host-side prep + pure-JAX reference only


# ----------------------------------------------------------------------------- kernel
def _gat_fused_kernel(*refs, layer_meta):
    """Fused: [GATConv -> ReLU] x (L-1) -> GATConv -> mean-pool -> log_softmax.

    Per-layer refs (4 each): W [K, H*C] bf16, P [H*C, 2H] f32 (att_dst | att_src packed
    block-diagonally), sbias [H, N, N] bf16 (edge-attr attention bias + -1e30 non-edge
    mask), bias [1, out_dim] f32.
    """
    x_ref, pool_ref = refs[0], refs[1]
    out_ref = refs[-1]
    lrefs = refs[2:-1]

    h = x_ref[...]                                                    # [N, K0] f32

    for li, (H, C, concat, relu) in enumerate(layer_meta):
        w_ref, p_ref, sbias_ref, cbias_ref = lrefs[4 * li: 4 * li + 4]

        # node-feature transform: bf16 operands, f32 accumulation (single MXU pass)
        xw = jnp.dot(h.astype(jnp.bfloat16), w_ref[...],
                     preferred_element_type=jnp.float32)              # [N, H*C] f32

        # fused per-node attention projections (all heads, src & dst, one matmul);
        # kept in f32 -- these tiny matmuls are not the MXU cost.
        proj = jnp.dot(xw, p_ref[...],
                       preferred_element_type=jnp.float32)            # [N, 2H] f32
        a_srcT = proj[:, H:].T                                        # [H, N] (tiny XLU)

        # head-batched attention: each head is an independent [N, N] slab (statically
        # unrolled equivalent of einsum('hij,hjc->hic')); no score concatenation and
        # no wasted off-diagonal aggregation MACs.
        outs = []
        for hh in range(H):
            s = (sbias_ref[hh].astype(jnp.float32)                    # edge bias + mask
                 + proj[:, hh:hh + 1]                                 # a_dst along rows
                 + a_srcT[hh:hh + 1, :])                              # a_src along lanes
            s = jnp.where(s > 0, s, 0.2 * s)                          # LeakyReLU(0.2)
            m = jnp.max(s, axis=-1, keepdims=True)
            e = jnp.exp(s - m)                                        # masked -> exact 0
            denom = jnp.sum(e, axis=-1, keepdims=True) + 1e-16        # PyG +1e-16
            # deferred normalization: aggregate unnormalized weights (f32 matmul), then
            # scale the [N, C] result via the EUP reciprocal instead of dividing [N, N].
            agg = jnp.dot(e, xw[:, hh * C:(hh + 1) * C],
                          preferred_element_type=jnp.float32)         # [N, C] f32
            outs.append(agg * pl.reciprocal(denom, approx=True))

        if concat:
            out = outs[0] if H == 1 else jnp.concatenate(outs, axis=-1)   # [N, H*C]
        else:                                                              # mean heads
            out = outs[0]
            for o in outs[1:]:
                out = out + o
            out = out * (1.0 / H)
        out = out + cbias_ref[...]                                    # conv bias
        if relu:
            out = jnp.maximum(out, 0.0)
        # F.dropout(p=0.5, training=False) -> identity in inference mode
        h = out

    # global_mean_pool (mean weights folded into pool matrix) + log_softmax, all f32
    y = jnp.dot(pool_ref[...], h, preferred_element_type=jnp.float32)  # [G, K_last]
    mm = jnp.max(y, axis=-1, keepdims=True)
    lse = jnp.log(jnp.sum(jnp.exp(y - mm), axis=-1, keepdims=True)) + mm
    out_ref[...] = y - lse
    # TODO(synk): [G, num_classes] = [2, 4] is a masked partial store; pad toward 128
    # lanes (or put graphs on the lane axis) if num_graphs / num_classes ever grow.


# ----------------------------------------------------------------------------- host-side prep
def prepare_layer_inputs(p, adj, edge_dense):
    """One-time fold of lin_edge/att_edge + adjacency mask; pack attention vectors."""
    H, C = p["heads"], p["out_per_head"]
    edge_dim = edge_dense.shape[0]

    # v[d, h] = sum_c W_edge[d, h*C + c] * att_edge[h, c]
    vedge = jnp.einsum("dhc,hc->dh", p["W_edge"].reshape(edge_dim, H, C),
                       p["att_edge"], precision=HIGHEST)
    # eb[h, i, j] = edge_attr(j->i) . v[:, h]; non-edges get -1e30 (masked out of softmax)
    eb = jnp.einsum("dh,dij->hij", vedge, edge_dense, precision=HIGHEST)   # [H, N, N]
    maskbias = jnp.where(adj > 0, 0.0, -1e30).astype(jnp.float32)
    sbias = (eb + maskbias[None]).astype(jnp.bfloat16)                     # [H, N, N] bf16

    # P packs att_dst (cols 0..H-1) and att_src (cols H..2H-1) block-diagonally so one
    # [N,H*C] x [H*C,2H] matmul yields every per-node attention term.
    att_src = np.asarray(p["att_src"], np.float32)
    att_dst = np.asarray(p["att_dst"], np.float32)
    P = np.zeros((H * C, 2 * H), np.float32)
    for hh in range(H):
        P[hh * C:(hh + 1) * C, hh] = att_dst[hh]
        P[hh * C:(hh + 1) * C, H + hh] = att_src[hh]

    ins = [p["W"].astype(jnp.bfloat16), jnp.asarray(P), sbias,
           p["bias"].astype(jnp.float32)]
    return ins, (H, C, p["concat"])


def prepare_gat_params(layers, adj, edge_dense):
    """Hoisted prep: depends only on weights + static graph; run ONCE, not per call."""
    flat, meta = [], []
    for li, p in enumerate(layers):
        ins, m = prepare_layer_inputs(p, adj, edge_dense)
        flat.extend(ins)
        meta.append(m + (li != len(layers) - 1,))   # (heads, out_per_head, concat, relu)
    return flat, tuple(meta)


def build_gat_forward(layer_meta, num_graphs, num_classes):
    """Returns a jitted forward(x, pool_mat, *layer_arrays) -> [G, num_classes]."""
    kernel = functools.partial(_gat_fused_kernel, layer_meta=layer_meta)
    vmem = pl.BlockSpec(memory_space=pltpu.MemorySpace.VMEM)

    def fwd(x, pool_mat, *layer_arrays):
        # Gridless single call: every tensor here is tiny (<100 KB total), latency-bound.
        # TODO(synk): for much larger graphs add a destination-row-tile grid with
        # dimension_semantics=("parallel",) (2nd TC on v7x), tile sbias against v7x's
        # 64 MiB VMEM, and pad N to a multiple of 128 for MXU/lane occupancy on v6e/v7x.
        return pl.pallas_call(
            kernel,
            out_shape=jax.ShapeDtypeStruct((num_graphs, num_classes), jnp.float32),
            in_specs=[vmem] * (2 + len(layer_arrays)),
            out_specs=vmem,
        )(x.astype(jnp.float32), pool_mat.astype(jnp.float32), *layer_arrays)

    return jax.jit(fwd)


# ----------------------------------------------------------------------------- params / graph glue
def init_gat_conv(key, fin, out, heads, edge_dim, concat):
    k = jax.random.split(key, 6)
    hc = heads * out
    W = jax.random.normal(k[0], (fin, hc), jnp.float32) / np.sqrt(fin)
    att_src = jax.random.normal(k[1], (heads, out), jnp.float32) / np.sqrt(out)
    att_dst = jax.random.normal(k[2], (heads, out), jnp.float32) / np.sqrt(out)
    W_edge = jax.random.normal(k[3], (edge_dim, hc), jnp.float32) / np.sqrt(edge_dim)
    att_edge = jax.random.normal(k[4], (heads, out), jnp.float32) / np.sqrt(out)
    out_dim = hc if concat else out
    bias = jax.random.normal(k[5], (1, out_dim), jnp.float32) * 0.1
    return dict(W=W, att_src=att_src, att_dst=att_dst, W_edge=W_edge,
                att_edge=att_edge, bias=bias,
                heads=heads, out_per_head=out, concat=concat)


def build_graph(num_graphs, nodes_per_graph, edge_dim, key):
    srcs, dsts = [], []
    for g in range(num_graphs):
        off = g * nodes_per_graph
        for i in range(nodes_per_graph):
            j = (i + 1) % nodes_per_graph
            srcs += [off + i, off + j]          # bidirectional ring
            dsts += [off + j, off + i]
            k2 = (i + 5) % nodes_per_graph      # extra chord
            srcs.append(off + i)
            dsts.append(off + k2)
    src = np.array(srcs, np.int32)
    dst = np.array(dsts, np.int32)
    edge_attr = np.asarray(jax.random.normal(key, (src.shape[0], edge_dim), jnp.float32))
    return src, dst, edge_attr


def add_self_loops_mean(src, dst, edge_attr, num_nodes):
    """PyG add_self_loops(fill_value='mean'): self-loop attr = mean of incoming edge attrs."""
    D = edge_attr.shape[1]
    loop_sum = np.zeros((num_nodes, D), np.float32)
    np.add.at(loop_sum, dst, edge_attr)
    cnt = np.zeros((num_nodes,), np.float32)
    np.add.at(cnt, dst, 1.0)
    loop_attr = loop_sum / np.maximum(cnt, 1.0)[:, None]
    rng = np.arange(num_nodes, dtype=np.int32)
    return (np.concatenate([src, rng]), np.concatenate([dst, rng]),
            np.concatenate([edge_attr, loop_attr], axis=0).astype(np.float32))


# ----------------------------------------------------------------------------- pure-JAX reference
def ref_gat_layer(x, p, src, dst, edge_attr, *, relu):
    N = x.shape[0]
    H, C, concat = p["heads"], p["out_per_head"], p["concat"]
    xw = jnp.dot(x, p["W"], precision=HIGHEST).reshape(N, H, C)
    a_src = jnp.sum(xw * p["att_src"][None], axis=-1)                     # [N, H]
    a_dst = jnp.sum(xw * p["att_dst"][None], axis=-1)
    ew = jnp.dot(edge_attr, p["W_edge"], precision=HIGHEST).reshape(-1, H, C)
    a_edge = jnp.sum(ew * p["att_edge"][None], axis=-1)                   # [E, H]
    logit = a_src[src] + a_dst[dst] + a_edge
    logit = jnp.where(logit > 0, logit, 0.2 * logit)
    lmax = jax.ops.segment_max(logit, dst, num_segments=N)
    e = jnp.exp(logit - lmax[dst])
    denom = jax.ops.segment_sum(e, dst, num_segments=N) + 1e-16
    alpha = e / denom[dst]
    msg = xw[src] * alpha[:, :, None]
    out = jax.ops.segment_sum(msg, dst, num_segments=N)                   # [N, H, C]
    out = out.reshape(N, H * C) if concat else out.mean(axis=1)
    out = out + p["bias"]
    return jnp.maximum(out, 0.0) if relu else out


def ref_forward(x, layers, src, dst, edge_attr, batch, num_graphs):
    h = x
    for li, p in enumerate(layers):
        h = ref_gat_layer(h, p, src, dst, edge_attr, relu=(li != len(layers) - 1))
    counts = jax.ops.segment_sum(jnp.ones_like(batch, jnp.float32), batch,
                                 num_segments=num_graphs)
    pooled = jax.ops.segment_sum(h, batch, num_segments=num_graphs) / counts[:, None]
    return jax.nn.log_softmax(pooled, axis=1)


# ----------------------------------------------------------------------------- main
if __name__ == "__main__":
    key = jax.random.PRNGKey(0)
    k_x, k_e, k_p = jax.random.split(key, 3)

    num_graphs, nodes_per_graph = 2, 32            # "32 genes" -> 32 nodes per graph
    in_channels, hidden_dim, num_classes = 16, 32, 4
    num_layers, heads, edge_dim = 3, 2, 3
    N = num_graphs * nodes_per_graph

    # inputs: x, edge_index, edge_attr, batch
    x = jax.random.normal(k_x, (N, in_channels), jnp.float32)
    src, dst, edge_attr = build_graph(num_graphs, nodes_per_graph, edge_dim, k_e)
    batch = np.repeat(np.arange(num_graphs), nodes_per_graph).astype(np.int32)

    # GATConv default add_self_loops=True, fill_value='mean' (identical per layer);
    # every destination row therefore has >= 1 real edge, so the -1e30 mask is safe.
    src_a, dst_a, ea_a = add_self_loops_mean(src, dst, edge_attr, N)

    # densify graph for the TPU kernel
    # TODO(synk): dense adjacency collapses parallel/duplicate edges; the synthetic
    # graph here has unique edges, matching PyG exactly.
    adj = np.zeros((N, N), np.float32)
    adj[dst_a, src_a] = 1.0
    edge_dense = np.zeros((edge_dim, N, N), np.float32)
    edge_dense[:, dst_a, src_a] = ea_a.T
    counts = np.bincount(batch, minlength=num_graphs).astype(np.float32)
    pool_mat = np.zeros((num_graphs, N), np.float32)
    pool_mat[batch, np.arange(N)] = 1.0 / counts[batch]

    # parameters (deterministic, synthetic)
    pkeys = jax.random.split(k_p, num_layers)
    layers = [init_gat_conv(pkeys[0], in_channels, hidden_dim, heads, edge_dim, True)]
    for l in range(num_layers - 2):
        layers.append(init_gat_conv(pkeys[l + 1], hidden_dim * heads, hidden_dim,
                                    heads, edge_dim, True))
    layers.append(init_gat_conv(pkeys[-1], hidden_dim * heads, num_classes,
                                1, edge_dim, False))

    # One-time prep (hoisted out of the forward), then a jitted forward that can be
    # called repeatedly with zero host-side prep / retracing.
    layer_arrays, layer_meta = prepare_gat_params(layers, jnp.asarray(adj),
                                                  jnp.asarray(edge_dense))
    forward = build_gat_forward(layer_meta, num_graphs, num_classes)

    out = forward(x, jnp.asarray(pool_mat), *layer_arrays)
    out = jax.block_until_ready(out)

    # correctness check against a pure-JAX edge-list reference (PyG semantics, f32
    # HIGHEST).  Attention logits / alpha are now f32 in the kernel (only the feature
    # transform matmul and the precomputed edge bias are bf16), so this tolerance —
    # kept from the previous all-bf16 version — is conservative.
    ref = ref_forward(x, layers, jnp.asarray(src_a), jnp.asarray(dst_a),
                      jnp.asarray(ea_a), jnp.asarray(batch), num_graphs)
    np.testing.assert_allclose(np.asarray(out), np.asarray(ref), atol=5e-2, rtol=5e-2)

    print("KERNEL_OK")
</pallas_src>

<mosaic_0001>
module attributes {stable_mosaic.version = 11 : i64} {
  func.func @_gat_fused_kernel(%arg0: memref<64x16xf32, #tpu.memory_space<vmem>>, %arg1: memref<2x64xf32, #tpu.memory_space<vmem>>, %arg2: memref<16x64xbf16, #tpu.memory_space<vmem>>, %arg3: memref<64x4xf32, #tpu.memory_space<vmem>>, %arg4: memref<2x64x64xbf16, #tpu.memory_space<vmem>>, %arg5: memref<1x64xf32, #tpu.memory_space<vmem>>, %arg6: memref<64x64xbf16, #tpu.memory_space<vmem>>, %arg7: memref<64x4xf32, #tpu.memory_space<vmem>>, %arg8: memref<2x64x64xbf16, #tpu.memory_space<vmem>>, %arg9: memref<1x64xf32, #tpu.memory_space<vmem>>, %arg10: memref<64x4xbf16, #tpu.memory_space<vmem>>, %arg11: memref<4x2xf32, #tpu.memory_space<vmem>>, %arg12: memref<1x64x64xbf16, #tpu.memory_space<vmem>>, %arg13: memref<1x4xf32, #tpu.memory_space<vmem>>, %arg14: memref<2x4xf32, #tpu.memory_space<vmem>>) attributes {dimension_semantics = [], scalar_prefetch = 0 : i64, scratch_operands = 0 : i64, tpu.core_type = #tpu.core_type<tc>} {
    %c0 = arith.constant 0 : index
    %c0_0 = arith.constant 0 : index
    %0 = vector.load %arg0[%c0, %c0_0] : memref<64x16xf32, #tpu.memory_space<vmem>>, vector<64x16xf32>
    %1 = arith.truncf %0 : vector<64x16xf32> to vector<64x16xbf16>
    %c0_1 = arith.constant 0 : index
    %c0_2 = arith.constant 0 : index
    %2 = vector.load %arg2[%c0_1, %c0_2] : memref<16x64xbf16, #tpu.memory_space<vmem>>, vector<16x64xbf16>
    %cst = arith.constant dense<0.000000e+00> : vector<64x64xf32>
    %3 = tpu.matmul %1, %2, %cst {dimension_numbers = #tpu.dot_dimension_numbers<[1], [0], [0], [1], [0, 0, 1, 1], [], []>} : vector<64x16xbf16>, vector<16x64xbf16>, vector<64x64xf32> -> vector<64x64xf32>
    %c0_3 = arith.constant 0 : index
    %c0_4 = arith.constant 0 : index
    %4 = vector.load %arg3[%c0_3, %c0_4] : memref<64x4xf32, #tpu.memory_space<vmem>>, vector<64x4xf32>
    %cst_5 = arith.constant dense<0.000000e+00> : vector<64x4xf32>
    %5 = tpu.matmul %3, %4, %cst_5 {dimension_numbers = #tpu.dot_dimension_numbers<[1], [0], [0], [1], [0, 0, 1, 1], [], []>} : vector<64x64xf32>, vector<64x4xf32>, vector<64x4xf32> -> vector<64x4xf32>
    %6 = vector.extract_strided_slice %5 {offsets = [0, 2], sizes = [64, 2], strides = [1, 1]} : vector<64x4xf32> to vector<64x2xf32>
    %7 = tpu.transpose %6, [1, 0] : vector<64x2xf32> -> vector<2x64xf32>
    %c0_6 = arith.constant 0 : index
    %c0_7 = arith.constant 0 : index
    %c0_8 = arith.constant 0 : index
    %8 = vector.load %arg4[%c0_6, %c0_7, %c0_8] : memref<2x64x64xbf16, #tpu.memory_space<vmem>>, vector<1x64x64xbf16>
    %9 = vector.shape_cast %8 : vector<1x64x64xbf16> to vector<64x64xbf16>
    %10 = arith.extf %9 : vector<64x64xbf16> to vector<64x64xf32>
    %11 = vector.extract_strided_slice %5 {offsets = [0, 0], sizes = [64, 1], strides = [1, 1]} : vector<64x4xf32> to vector<64x1xf32>
    %12 = vector.broadcast %11 : vector<64x1xf32> to vector<64x64xf32>
    %13 = arith.addf %10, %12 : vector<64x64xf32>
    %14 = vector.extract_strided_slice %7 {offsets = [0, 0], sizes = [1, 64], strides = [1, 1]} : vector<2x64xf32> to vector<1x64xf32>
    %15 = vector.broadcast %14 : vector<1x64xf32> to vector<64x64xf32>
    %16 = arith.addf %13, %15 : vector<64x64xf32>
    %cst_9 = arith.constant 0.000000e+00 : f32
    %17 = vector.broadcast %cst_9 : f32 to vector<64x64xf32>
    %18 = arith.cmpf ogt, %16, %17 : vector<64x64xf32>
    %cst_10 = arith.constant 2.000000e-01 : f32
    %19 = vector.broadcast %cst_10 : f32 to vector<64x64xf32>
    %20 = arith.mulf %19, %16 : vector<64x64xf32>
    %21 = arith.select %18, %16, %20 : vector<64x64xi1>, vector<64x64xf32>
    %cst_11 = arith.constant dense<0xFF800000> : vector<64xf32>
    %22 = vector.multi_reduction <maximumf>, %21, %cst_11 [1] : vector<64x64xf32> to vector<64xf32>
    %23 = vector.shape_cast %22 : vector<64xf32> to vector<64x1xf32>
    %24 = vector.broadcast %23 : vector<64x1xf32> to vector<64x64xf32>
    %25 = arith.subf %21, %24 : vector<64x64xf32>
    %26 = math.exp %25 : vector<64x64xf32>
    %cst_12 = arith.constant dense<0.000000e+00> : vector<64xf32>
    %27 = vector.multi_reduction <add>, %26, %cst_12 [1] : vector<64x64xf32> to vector<64xf32>
    %28 = vector.shape_cast %27 : vector<64xf32> to vector<64x1xf32>
    %cst_13 = arith.constant 1.000000e-16 : f32
    %29 = vector.broadcast %cst_13 : f32 to vector<64x1xf32>
    %30 = arith.addf %28, %29 : vector<64x1xf32>
    %31 = vector.extract_strided_slice %3 {offsets = [0, 0], sizes = [64, 32], strides = [1, 1]} : vector<64x64xf32> to vector<64x32xf32>
    %cst_14 = arith.constant dense<0.000000e+00> : vector<64x32xf32>
    %32 = tpu.matmul %26, %31, %cst_14 {dimension_numbers = #tpu.dot_dimension_numbers<[1], [0], [0], [1], [0, 0, 1, 1], [], []>} : vector<64x64xf32>, vector<64x32xf32>, vector<64x32xf32> -> vector<64x32xf32>
    %33 = tpu.reciprocal %30 {approx = true} : vector<64x1xf32> -> vector<64x1xf32>
    %34 = vector.broadcast %33 : vector<64x1xf32> to vector<64x32xf32>
    %35 = arith.mulf %32, %34 : vector<64x32xf32>
    %c1 = arith.constant 1 : index
    %c0_15 = arith.constant 0 : index
    %c0_16 = arith.constant 0 : index
    %36 = vector.load %arg4[%c1, %c0_15, %c0_16] : memref<2x64x64xbf16, #tpu.memory_space<vmem>>, vector<1x64x64xbf16>
    %37 = vector.shape_cast %36 : vector<1x64x64xbf16> to vector<64x64xbf16>
    %38 = arith.extf %37 : vector<64x64xbf16> to vector<64x64xf32>
    %39 = vector.extract_strided_slice %5 {offsets = [0, 1], sizes = [64, 1], strides = [1, 1]} : vector<64x4xf32> to vector<64x1xf32>
    %40 = vector.broadcast %39 : vector<64x1xf32> to vector<64x64xf32>
    %41 = arith.addf %38, %40 : vector<64x64xf32>
    %42 = vector.extract_strided_slice %7 {offsets = [1, 0], sizes = [1, 64], strides = [1, 1]} : vector<2x64xf32> to vector<1x64xf32>
    %43 = vector.broadcast %42 : vector<1x64xf32> to vector<64x64xf32>
    %44 = arith.addf %41, %43 : vector<64x64xf32>
    %cst_17 = arith.constant 0.000000e+00 : f32
    %45 = vector.broadcast %cst_17 : f32 to vector<64x64xf32>
    %46 = arith.cmpf ogt, %44, %45 : vector<64x64xf32>
    %cst_18 = arith.constant 2.000000e-01 : f32
    %47 = vector.broadcast %cst_18 : f32 to vector<64x64xf32>
    %48 = arith.mulf %47, %44 : vector<64x64xf32>
    %49 = arith.select %46, %44, %48 : vector<64x64xi1>, vector<64x64xf32>
    %cst_19 = arith.constant dense<0xFF800000> : vector<64xf32>
    %50 = vector.multi_reduction <maximumf>, %49, %cst_19 [1] : vector<64x64xf32> to vector<64xf32>
    %51 = vector.shape_cast %50 : vector<64xf32> to vector<64x1xf32>
    %52 = vector.broadcast %51 : vector<64x1xf32> to vector<64x64xf32>
    %53 = arith.subf %49, %52 : vector<64x64xf32>
    %54 = math.exp %53 : vector<64x64xf32>
    %cst_20 = arith.constant dense<0.000000e+00> : vector<64xf32>
    %55 = vector.multi_reduction <add>, %54, %cst_20 [1] : vector<64x64xf32> to vector<64xf32>
    %56 = vector.shape_cast %55 : vector<64xf32> to vector<64x1xf32>
    %cst_21 = arith.constant 1.000000e-16 : f32
    %57 = vector.broadcast %cst_21 : f32 to vector<64x1xf32>
    %58 = arith.addf %56, %57 : vector<64x1xf32>
    %59 = vector.extract_strided_slice %3 {offsets = [0, 32], sizes = [64, 32], strides = [1, 1]} : vector<64x64xf32> to vector<64x32xf32>
    %cst_22 = arith.constant dense<0.000000e+00> : vector<64x32xf32>
    %60 = tpu.matmul %54, %59, %cst_22 {dimension_numbers = #tpu.dot_dimension_numbers<[1], [0], [0], [1], [0, 0, 1, 1], [], []>} : vector<64x64xf32>, vector<64x32xf32>, vector<64x32xf32> -> vector<64x32xf32>
    %61 = tpu.reciprocal %58 {approx = true} : vector<64x1xf32> -> vector<64x1xf32>
    %62 = vector.broadcast %61 : vector<64x1xf32> to vector<64x32xf32>
    %63 = arith.mulf %60, %62 : vector<64x32xf32>
    %64 = tpu.concatenate %35, %63 in 1 : vector<64x32xf32>, vector<64x32xf32> -> vector<64x64xf32>
    %c0_23 = arith.constant 0 : index
    %c0_24 = arith.constant 0 : index
    %65 = vector.load %arg5[%c0_23, %c0_24] : memref<1x64xf32, #tpu.memory_space<vmem>>, vector<1x64xf32>
    %66 = vector.broadcast %65 : vector<1x64xf32> to vector<64x64xf32>
    %67 = arith.addf %64, %66 : vector<64x64xf32>
    %cst_25 = arith.constant 0.000000e+00 : f32
    %68 = vector.broadcast %cst_25 : f32 to vector<64x64xf32>
    %69 = arith.maximumf %67, %68 : vector<64x64xf32>
    %70 = arith.truncf %69 : vector<64x64xf32> to vector<64x64xbf16>
    %c0_26 = arith.constant 0 : index
    %c0_27 = arith.constant 0 : index
    %71 = vector.load %arg6[%c0_26, %c0_27] : memref<64x64xbf16, #tpu.memory_space<vmem>>, vector<64x64xbf16>
    %cst_28 = arith.constant dense<0.000000e+00> : vector<64x64xf32>
    %72 = tpu.matmul %70, %71, %cst_28 {dimension_numbers = #tpu.dot_dimension_numbers<[1], [0], [0], [1], [0, 0, 1, 1], [], []>} : vector<64x64xbf16>, vector<64x64xbf16>, vector<64x64xf32> -> vector<64x64xf32>
    %c0_29 = arith.constant 0 : index
    %c0_30 = arith.constant 0 : index
    %73 = vector.load %arg7[%c0_29, %c0_30] : memref<64x4xf32, #tpu.memory_space<vmem>>, vector<64x4xf32>
    %cst_31 = arith.constant dense<0.000000e+00> : vector<64x4xf32>
    %74 = tpu.matmul %72, %73, %cst_31 {dimension_numbers = #tpu.dot_dimension_numbers<[1], [0], [0], [1], [0, 0, 1, 1], [], []>} : vector<64x64xf32>, vector<64x4xf32>, vector<64x4xf32> -> vector<64x4xf32>
    %75 = vector.extract_strided_slice %74 {offsets = [0, 2], sizes = [64, 2], strides = [1, 1]} : vector<64x4xf32> to vector<64x2xf32>
    %76 = tpu.transpose %75, [1, 0] : vector<64x2xf32> -> vector<2x64xf32>
    %c0_32 = arith.constant 0 : index
    %c0_33 = arith.constant 0 : index
    %c0_34 = arith.constant 0 : index
    %77 = vector.load %arg8[%c0_32, %c0_33, %c0_34] : memref<2x64x64xbf16, #tpu.memory_space<vmem>>, vector<1x64x64xbf16>
    %78 = vector.shape_cast %77 : vector<1x64x64xbf16> to vector<64x64xbf16>
    %79 = arith.extf %78 : vector<64x64xbf16> to vector<64x64xf32>
    %80 = vector.extract_strided_slice %74 {offsets = [0, 0], sizes = [64, 1], strides = [1, 1]} : vector<64x4xf32> to vector<64x1xf32>
    %81 = vector.broadcast %80 : vector<64x1xf32> to vector<64x64xf32>
    %82 = arith.addf %79, %81 : vector<64x64xf32>
    %83 = vector.extract_strided_slice %76 {offsets = [0, 0], sizes = [1, 64], strides = [1, 1]} : vector<2x64xf32> to vector<1x64xf32>
    %84 = vector.broadcast %83 : vector<1x64xf32> to vector<64x64xf32>
    %85 = arith.addf %82, %84 : vector<64x64xf32>
    %cst_35 = arith.constant 0.000000e+00 : f32
    %86 = vector.broadcast %cst_35 : f32 to vector<64x64xf32>
    %87 = arith.cmpf ogt, %85, %86 : vector<64x64xf32>
    %cst_36 = arith.constant 2.000000e-01 : f32
    %88 = vector.broadcast %cst_36 : f32 to vector<64x64xf32>
    %89 = arith.mulf %88, %85 : vector<64x64xf32>
    %90 = arith.select %87, %85, %89 : vector<64x64xi1>, vector<64x64xf32>
    %cst_37 = arith.constant dense<0xFF800000> : vector<64xf32>
    %91 = vector.multi_reduction <maximumf>, %90, %cst_37 [1] : vector<64x64xf32> to vector<64xf32>
    %92 = vector.shape_cast %91 : vector<64xf32> to vector<64x1xf32>
    %93 = vector.broadcast %92 : vector<64x1xf32> to vector<64x64xf32>
    %94 = arith.subf %90, %93 : vector<64x64xf32>
    %95 = math.exp %94 : vector<64x64xf32>
    %cst_38 = arith.constant dense<0.000000e+00> : vector<64xf32>
    %96 = vector.multi_reduction <add>, %95, %cst_38 [1] : vector<64x64xf32> to vector<64xf32>
    %97 = vector.shape_cast %96 : vector<64xf32> to vector<64x1xf32>
    %cst_39 = arith.constant 1.000000e-16 : f32
    %98 = vector.broadcast %cst_39 : f32 to vector<64x1xf32>
    %99 = arith.addf %97, %98 : vector<64x1xf32>
    %100 = vector.extract_strided_slice %72 {offsets = [0, 0], sizes = [64, 32], strides = [1, 1]} : vector<64x64xf32> to vector<64x32xf32>
    %cst_40 = arith.constant dense<0.000000e+00> : vector<64x32xf32>
    %101 = tpu.matmul %95, %100, %cst_40 {dimension_numbers = #tpu.dot_dimension_numbers<[1], [0], [0], [1], [0, 0, 1, 1], [], []>} : vector<64x64xf32>, vector<64x32xf32>, vector<64x32xf32> -> vector<64x32xf32>
    %102 = tpu.reciprocal %99 {approx = true} : vector<64x1xf32> -> vector<64x1xf32>
    %103 = vector.broadcast %102 : vector<64x1xf32> to vector<64x32xf32>
    %104 = arith.mulf %101, %103 : vector<64x32xf32>
    %c1_41 = arith.constant 1 : index
    %c0_42 = arith.constant 0 : index
    %c0_43 = arith.constant 0 : index
    %105 = vector.load %arg8[%c1_41, %c0_42, %c0_43] : memref<2x64x64xbf16, #tpu.memory_space<vmem>>, vector<1x64x64xbf16>
    %106 = vector.shape_cast %105 : vector<1x64x64xbf16> to vector<64x64xbf16>
    %107 = arith.extf %106 : vector<64x64xbf16> to vector<64x64xf32>
    %108 = vector.extract_strided_slice %74 {offsets = [0, 1], sizes = [64, 1], strides = [1, 1]} : vector<64x4xf32> to vector<64x1xf32>
    %109 = vector.broadcast %108 : vector<64x1xf32> to vector<64x64xf32>
    %110 = arith.addf %107, %109 : vector<64x64xf32>
    %111 = vector.extract_strided_slice %76 {offsets = [1, 0], sizes = [1, 64], strides = [1, 1]} : vector<2x64xf32> to vector<1x64xf32>
    %112 = vector.broadcast %111 : vector<1x64xf32> to vector<64x64xf32>
    %113 = arith.addf %110, %112 : vector<64x64xf32>
    %cst_44 = arith.constant 0.000000e+00 : f32
    %114 = vector.broadcast %cst_44 : f32 to vector<64x64xf32>
    %115 = arith.cmpf ogt, %113, %114 : vector<64x64xf32>
    %cst_45 = arith.constant 2.000000e-01 : f32
    %116 = vector.broadcast %cst_45 : f32 to vector<64x64xf32>
    %117 = arith.mulf %116, %113 : vector<64x64xf32>
    %118 = arith.select %115, %113, %117 : vector<64x64xi1>, vector<64x64xf32>
    %cst_46 = arith.constant dense<0xFF800000> : vector<64xf32>
    %119 = vector.multi_reduction <maximumf>, %118, %cst_46 [1] : vector<64x64xf32> to vector<64xf32>
    %120 = vector.shape_cast %119 : vector<64xf32> to vector<64x1xf32>
    %121 = vector.broadcast %120 : vector<64x1xf32> to vector<64x64xf32>
    %122 = arith.subf %118, %121 : vector<64x64xf32>
    %123 = math.exp %122 : vector<64x64xf32>
    %cst_47 = arith.constant dense<0.000000e+00> : vector<64xf32>
    %124 = vector.multi_reduction <add>, %123, %cst_47 [1] : vector<64x64xf32> to vector<64xf32>
    %125 = vector.shape_cast %124 : vector<64xf32> to vector<64x1xf32>
    %cst_48 = arith.constant 1.000000e-16 : f32
    %126 = vector.broadcast %cst_48 : f32 to vector<64x1xf32>
    %127 = arith.addf %125, %126 : vector<64x1xf32>
    %128 = vector.extract_strided_slice %72 {offsets = [0, 32], sizes = [64, 32], strides = [1, 1]} : vector<64x64xf32> to vector<64x32xf32>
    %cst_49 = arith.constant dense<0.000000e+00> : vector<64x32xf32>
    %129 = tpu.matmul %123, %128, %cst_49 {dimension_numbers = #tpu.dot_dimension_numbers<[1], [0], [0], [1], [0, 0, 1, 1], [], []>} : vector<64x64xf32>, vector<64x32xf32>, vector<64x32xf32> -> vector<64x32xf32>
    %130 = tpu.reciprocal %127 {approx = true} : vector<64x1xf32> -> vector<64x1xf32>
    %131 = vector.broadcast %130 : vector<64x1xf32> to vector<64x32xf32>
    %132 = arith.mulf %129, %131 : vector<64x32xf32>
    %133 = tpu.concatenate %104, %132 in 1 : vector<64x32xf32>, vector<64x32xf32> -> vector<64x64xf32>
    %c0_50 = arith.constant 0 : index
    %c0_51 = arith.constant 0 : index
    %134 = vector.load %arg9[%c0_50, %c0_51] : memref<1x64xf32, #tpu.memory_space<vmem>>, vector<1x64xf32>
    %135 = vector.broadcast %134 : vector<1x64xf32> to vector<64x64xf32>
    %136 = arith.addf %133, %135 : vector<64x64xf32>
    %cst_52 = arith.constant 0.000000e+00 : f32
    %137 = vector.broadcast %cst_52 : f32 to vector<64x64xf32>
    %138 = arith.maximumf %136, %137 : vector<64x64xf32>
    %139 = arith.truncf %138 : vector<64x64xf32> to vector<64x64xbf16>
    %c0_53 = arith.constant 0 : index
    %c0_54 = arith.constant 0 : index
    %140 = vector.load %arg10[%c0_53, %c0_54] : memref<64x4xbf16, #tpu.memory_space<vmem>>, vector<64x4xbf16>
    %cst_55 = arith.constant dense<0.000000e+00> : vector<64x4xf32>
    %141 = tpu.matmul %139, %140, %cst_55 {dimension_numbers = #tpu.dot_dimension_numbers<[1], [0], [0], [1], [0, 0, 1, 1], [], []>} : vector<64x64xbf16>, vector<64x4xbf16>, vector<64x4xf32> -> vector<64x4xf32>
    %c0_56 = arith.constant 0 : index
    %c0_57 = arith.constant 0 : index
    %142 = vector.load %arg11[%c0_56, %c0_57] : memref<4x2xf32, #tpu.memory_space<vmem>>, vector<4x2xf32>
    %cst_58 = arith.constant dense<0.000000e+00> : vector<64x2xf32>
    %143 = tpu.matmul %141, %142, %cst_58 {dimension_numbers = #tpu.dot_dimension_numbers<[1], [0], [0], [1], [0, 0, 1, 1], [], []>} : vector<64x4xf32>, vector<4x2xf32>, vector<64x2xf32> -> vector<64x2xf32>
    %144 = vector.extract_strided_slice %143 {offsets = [0, 1], sizes = [64, 1], strides = [1, 1]} : vector<64x2xf32> to vector<64x1xf32>
    %145 = tpu.transpose %144, [1, 0] : vector<64x1xf32> -> vector<1x64xf32>
    %c0_59 = arith.constant 0 : index
    %c0_60 = arith.constant 0 : index
    %c0_61 = arith.constant 0 : index
    %146 = vector.load %arg12[%c0_59, %c0_60, %c0_61] : memref<1x64x64xbf16, #tpu.memory_space<vmem>>, vector<1x64x64xbf16>
    %147 = vector.shape_cast %146 : vector<1x64x64xbf16> to vector<64x64xbf16>
    %148 = arith.extf %147 : vector<64x64xbf16> to vector<64x64xf32>
    %149 = vector.extract_strided_slice %143 {offsets = [0, 0], sizes = [64, 1], strides = [1, 1]} : vector<64x2xf32> to vector<64x1xf32>
    %150 = vector.broadcast %149 : vector<64x1xf32> to vector<64x64xf32>
    %151 = arith.addf %148, %150 : vector<64x64xf32>
    %152 = vector.broadcast %145 : vector<1x64xf32> to vector<64x64xf32>
    %153 = arith.addf %151, %152 : vector<64x64xf32>
    %cst_62 = arith.constant 0.000000e+00 : f32
    %154 = vector.broadcast %cst_62 : f32 to vector<64x64xf32>
    %155 = arith.cmpf ogt, %153, %154 : vector<64x64xf32>
    %cst_63 = arith.constant 2.000000e-01 : f32
    %156 = vector.broadcast %cst_63 : f32 to vector<64x64xf32>
    %157 = arith.mulf %156, %153 : vector<64x64xf32>
    %158 = arith.select %155, %153, %157 : vector<64x64xi1>, vector<64x64xf32>
    %cst_64 = arith.constant dense<0xFF800000> : vector<64xf32>
    %159 = vector.multi_reduction <maximumf>, %158, %cst_64 [1] : vector<64x64xf32> to vector<64xf32>
    %160 = vector.shape_cast %159 : vector<64xf32> to vector<64x1xf32>
    %161 = vector.broadcast %160 : vector<64x1xf32> to vector<64x64xf32>
    %162 = arith.subf %158, %161 : vector<64x64xf32>
    %163 = math.exp %162 : vector<64x64xf32>
    %cst_65 = arith.constant dense<0.000000e+00> : vector<64xf32>
    %164 = vector.multi_reduction <add>, %163, %cst_65 [1] : vector<64x64xf32> to vector<64xf32>
    %165 = vector.shape_cast %164 : vector<64xf32> to vector<64x1xf32>
    %cst_66 = arith.constant 1.000000e-16 : f32
    %166 = vector.broadcast %cst_66 : f32 to vector<64x1xf32>
    %167 = arith.addf %165, %166 : vector<64x1xf32>
    %cst_67 = arith.constant dense<0.000000e+00> : vector<64x4xf32>
    %168 = tpu.matmul %163, %141, %cst_67 {dimension_numbers = #tpu.dot_dimension_numbers<[1], [0], [0], [1], [0, 0, 1, 1], [], []>} : vector<64x64xf32>, vector<64x4xf32>, vector<64x4xf32> -> vector<64x4xf32>
    %169 = tpu.reciprocal %167 {approx = true} : vector<64x1xf32> -> vector<64x1xf32>
    %170 = vector.broadcast %169 : vector<64x1xf32> to vector<64x4xf32>
    %171 = arith.mulf %168, %170 : vector<64x4xf32>
    %cst_68 = arith.constant 1.000000e+00 : f32
    %172 = vector.broadcast %cst_68 : f32 to vector<64x4xf32>
    %173 = arith.mulf %171, %172 : vector<64x4xf32>
    %c0_69 = arith.constant 0 : index
    %c0_70 = arith.constant 0 : index
    %174 = vector.load %arg13[%c0_69, %c0_70] : memref<1x4xf32, #tpu.memory_space<vmem>>, vector<1x4xf32>
    %175 = vector.broadcast %174 : vector<1x4xf32> to vector<64x4xf32>
    %176 = arith.addf %173, %175 : vector<64x4xf32>
    %c0_71 = arith.constant 0 : index
    %c0_72 = arith.constant 0 : index
    %177 = vector.load %arg1[%c0_71, %c0_72] : memref<2x64xf32, #tpu.memory_space<vmem>>, vector<2x64xf32>
    %cst_73 = arith.constant dense<0.000000e+00> : vector<2x4xf32>
    %178 = tpu.matmul %177, %176, %cst_73 {dimension_numbers = #tpu.dot_dimension_numbers<[1], [0], [0], [1], [0, 0, 1, 1], [], []>} : vector<2x64xf32>, vector<64x4xf32>, vector<2x4xf32> -> vector<2x4xf32>
    %cst_74 = arith.constant dense<0xFF800000> : vector<2xf32>
    %179 = vector.multi_reduction <maximumf>, %178, %cst_74 [1] : vector<2x4xf32> to vector<2xf32>
    %180 = vector.shape_cast %179 : vector<2xf32> to vector<2x1xf32>
    %181 = vector.broadcast %180 : vector<2x1xf32> to vector<2x4xf32>
    %182 = arith.subf %178, %181 : vector<2x4xf32>
    %183 = math.exp %182 : vector<2x4xf32>
    %cst_75 = arith.constant dense<0.000000e+00> : vector<2xf32>
    %184 = vector.multi_reduction <add>, %183, %cst_75 [1] : vector<2x4xf32> to vector<2xf32>
    %185 = vector.shape_cast %184 : vector<2xf32> to vector<2x1xf32>
    %186 = math.log %185 : vector<2x1xf32>
    %187 = arith.addf %186, %180 : vector<2x1xf32>
    %188 = vector.broadcast %187 : vector<2x1xf32> to vector<2x4xf32>
    %189 = arith.subf %178, %188 : vector<2x4xf32>
    %c0_76 = arith.constant 0 : index
    %c0_77 = arith.constant 0 : index
    %190 = vector.load %arg14[%c0_76, %c0_77] : memref<2x4xf32, #tpu.memory_space<vmem>>, vector<2x4xf32>
    tpu.vector_store %arg14[%c0_76, %c0_77], %189 {strides = array<i32>} : memref<2x4xf32, #tpu.memory_space<vmem>>, vector<2x4xf32>,
    return
  }
}

</mosaic_0001>

<bundles_post_ra>
// kernel: fwd.1
= control target key start
LH: loop header
LB: loop body
LE: loop exit
PB: predicated region body
PF: predicated region fallthrough
CT: control target
= control target key end

     0   :  { %vm69_vm0 = vcmask 130048   ;;  %s3458_s0 = inlined_call_operand.vmem [shape: f32[64,16], index: 0, kind: input, shape index: {}]   ;;  %s3459_s1 = inlined_call_operand.vmem [shape: f32[2,64], index: 1, kind: input, shape index: {}]   ;;  %s3460_s2 = inlined_call_operand.vmem [shape: bf16[16,64], index: 2, kind: input, shape index: {}]   ;;  %s3461_s3 = inlined_call_operand.vmem [shape: f32[64,4], index: 3, kind: input, shape index: {}]   ;;  %s3462_s4 = inlined_call_operand.vmem [shape: bf16[2,64,64], index: 4, kind: input, shape index: {}]   ;;  %s3463_s5 = inlined_call_operand.vmem [shape: f32[1,64], index: 5, kind: input, shape index: {}]   ;;  %s3464_s6 = inlined_call_operand.vmem [shape: bf16[64,64], index: 6, kind: input, shape index: {}]   ;;  %s3465_s7 = inlined_call_operand.vmem [shape: f32[64,4], index: 7, kind: input, shape index: {}]   ;;  %s3466_s8 = inlined_call_operand.vmem [shape: bf16[2,64,64], index: 8, kind: input, shape index: {}]   ;;  %s3467_s9 = inlined_call_operand.vmem [shape: f32[1,64], index: 9, kind: input, shape index: {}]   ;;  %s3468_s10 = inlined_call_operand.vmem [shape: bf16[64,4], index: 10, kind: input, shape index: {}]   ;;  %s3469_s11 = inlined_call_operand.vmem [shape: f32[4,2], index: 11, kind: input, shape index: {}]   ;;  %s3470_s12 = inlined_call_operand.vmem [shape: bf16[1,64,64], index: 12, kind: input, shape index: {}]   ;;  %s3471_s13 = inlined_call_operand.vmem [shape: f32[1,4], index: 13, kind: input, shape index: {}]   ;;  %s3472_s14 = inlined_call_operand.hbm [shape: f32[2,4], index: 14, kind: output, shape index: {}]  }
   0x1   :  { %v2293_v0 = vld [vmem:[%s3460_s2] sm:$0xff]  ;;  %v50_v2 = vld [vmem:[%s3458_s0 + $0x8] sm:$0xff] }
   0x2   :  { %v49_v1 = vld [vmem:[%s3458_s0] sm:$0xff]  ;;  %89 = vmatpush.bf16.msra.mxu0 %v2293_v0 }
   0x3   :  { %v57_v3 = vpack.c.bf16 %v50_v2, %v49_v1 }
   0x4   :  { %19 = vsyncpa [#allocation3], 0  ;;  %v51_v4 = vld [vmem:[%s3458_s0 + $0x10] sm:$0xff]  ;;  %v52_v5 = vld [vmem:[%s3458_s0 + $0x18] sm:$0xff]  ;;  %vm119_vm1 = vcmask 523264   ;;  %v2668_v29 = vmov 1  }
   0x5   :  { %2167 = vmatmul.msk.bf16.vlgmr.msra.gmra.mxu0 %vm69_vm0, %v57_v3  ;;  %v58_v6 = vpack.c.bf16 %v52_v5, %v51_v4  ;;  %v118_v7 = vld [vmem:[%s3461_s3 + $0x38] sm:$0xff]  ;;  %v117_v8 = vld [vmem:[%s3461_s3 + $0x30] sm:$0xff]  ;;  %v116_v9 = vld [vmem:[%s3461_s3 + $0x28] sm:$0xff]  ;;  %2438 = vset.pattern.permute.xlu1 %v2668_v29  ;;  %v2669_v33 = vmov 0   ;;  %s2154_s28 = sshll.u32 %s3472_s14, 4  ;;  %s2155_s28 = int_to_ptr.hbm [resolvable:$true] %s2154_s28 }
   0x6   :  { %152 = vmatpush.msra.mxu1 %v118_v7  ;;  %2399 = vmatpush.msra.mxu3 %v118_v7  ;;  %v115_v10 = vld [vmem:[%s3461_s3 + $0x20] sm:$0xff]  ;;  %v114_v11 = vld [vmem:[%s3461_s3 + $0x18] sm:$0xff]  ;;  %v113_v12 = vld [vmem:[%s3461_s3 + $0x10] sm:$0xff] }
   0x7   :  { %v53_v13 = vld [vmem:[%s3458_s0 + $0x20] sm:$0xff]  ;;  %v54_v14 = vld [vmem:[%s3458_s0 + $0x28] sm:$0xff]  ;;  %v55_v17 = vld [vmem:[%s3458_s0 + $0x30] sm:$0xff]  ;;  %2440 = vset.pattern.permute.xlu0 %v2668_v29  ;;  %2439 = vset.pattern.permute.xlu2 %v2669_v33 }
   0x8   :  { %153 = vmatpush.msra.mxu1 %v117_v8  ;;  %2400 = vmatpush.msra.mxu3 %v117_v8  ;;  %v112_v15 = vld [vmem:[%s3461_s3 + $0x8] sm:$0xff]  ;;  %v59_v16 = vpack.c.bf16 %v54_v14, %v53_v13  ;;  %v56_v18 = vld [vmem:[%s3458_s0 + $0x38] sm:$0xff]  ;;  %v111_v20 = vld [vmem:[%s3461_s3] sm:$0xff]  ;;  %s2667_s0 = smov 96   ;;  %s2670_s3 = smov 126  }
   0x9   :  { %v60_v19 = vpack.c.bf16 %v56_v18, %v55_v17  ;;  %v2388_v13 = vld [vmem:[%s3462_s4 + $0x38] sm:$0xff]  }
   0xa   :  { %154 = vmatpush.msra.mxu1 %v116_v9  ;;  %2401 = vmatpush.msra.mxu3 %v116_v9  ;;  %v2332_v17 = vunpack.c.l.bf16 %v2388_v13 }
   0xc   :  { %155 = vmatpush.msra.mxu1 %v115_v10  ;;  %2402 = vmatpush.msra.mxu3 %v115_v10 }
   0xe   :  { %156 = vmatpush.msra.mxu1 %v114_v11  ;;  %2403 = vmatpush.msra.mxu3 %v114_v11  ;;  %v2384_v11 = vld [vmem:[%s3462_s4 + $0x18] sm:$0xff]  }
   0xf   :  { %v2316_v14 = vunpack.c.l.bf16 %v2384_v11 }
  0x10   :  { %157 = vmatpush.msra.mxu1 %v113_v12  ;;  %2404 = vmatpush.msra.mxu3 %v113_v12  ;;  %v2385_v12 = vld [vmem:[%s3462_s4 + $0x20] sm:$0xff]  }
  0x12   :  { %158 = vmatpush.msra.mxu1 %v112_v15  ;;  %2405 = vmatpush.msra.mxu3 %v112_v15  ;;  %v2317_v15 = vunpack.c.h.bf16 %v2384_v11 }
  0x14   :  { %159 = vmatpush.msra.mxu1 %v111_v20  ;;  %2406 = vmatpush.msra.mxu3 %v111_v20 }
  0x15   :  { %2168 = vmatmul.msk.bf16.gmra.mxu0 %vm69_vm0, %v58_v6 }
  0x25   :  { %2169 = vmatmul.msk.bf16.gmra.mxu0 %vm69_vm0, %v59_v16  ;;  %v2320_v16 = vunpack.c.l.bf16 %v2385_v12 }
  0x35   :  { %2170 = vmatmul.msk.bf16.gmra.mxu0 %vm69_vm0, %v60_v19 }
  0x82   :  { %v2804_v21 = vpop.f32.mrf.mxu0 }
  0x83   :  { %2171 = vmatmul.msk.f32.vlgmr.msra.gmra.mxu1 %vm119_vm1, %v2804_v21 }
  0x8a   :  { %v2808_v22 = vpop.f32.mrf.mxu0 }
  0x8b   :  { %2172 = vmatmul.msk.f32.gmra.mxu1 %vm119_vm1, %v2808_v22  ;;  %v2443_v51 = vpack.i.bf16 %v2804_v21, %v2808_v22 }
  0x92   :  { %v96_v23 = vpop.f32.mrf.mxu0 }
  0x93   :  { %2173 = vmatmul.msk.f32.gmra.mxu1 %vm119_vm1, %v96_v23 }
  0x9a   :  { %v98_v24 = vpop.f32.mrf.mxu0 }
  0x9b   :  { %2174 = vmatmul.msk.f32.gmra.mxu1 %vm119_vm1, %v98_v24  ;;  %v2423_v25 = vpack.i.bf16 %v96_v23, %v98_v24 }
  0x9d   :  { %2424 = vrot.lane.b32.xlu1 %v2423_v25, %s2667_s0 }
  0xa2   :  { %v101_v26 = vpop.f32.mrf.mxu0 }
  0xa3   :  { %2175 = vmatmul.msk.f32.gmra.mxu1 %vm119_vm1, %v101_v26 }
  0xaa   :  { %v103_v27 = vpop.f32.mrf.mxu0 }
  0xab   :  { %2176 = vmatmul.msk.f32.gmra.mxu1 %vm119_vm1, %v103_v27  ;;  %v2428_v28 = vpack.i.bf16 %v101_v26, %v103_v27 }
  0xad   :  { %2429 = vrot.lane.b32.xlu0 %v2428_v28, %s2667_s0 }
  0xb2   :  { %v106_v30 = vpop.f32.mrf.mxu0 }
  0xb3   :  { %2177 = vmatmul.msk.f32.vlgmr.msra.gmra.mxu3 %vm119_vm1, %v106_v30 }
  0xba   :  { %v108_v31 = vpop.f32.mrf.mxu0 }
  0xbb   :  { %2178 = vmatmul.msk.f32.gmra.mxu3 %vm119_vm1, %v108_v31  ;;  %450 = vmatpush.msra.mxu2 %v108_v31  ;;  %v2433_v32 = vpack.i.bf16 %v106_v30, %v108_v31 }
  0xbc   :  { %2407 = vmatpush.msrb.mxu3 %v108_v31 }
  0xbd   :  { %2434 = vrot.lane.b32.xlu1 %v2433_v32, %s2667_s0  ;;  %451 = vmatpush.msra.mxu2 %v106_v30 }
  0xbe   :  { %2408 = vmatpush.msrb.mxu3 %v106_v30 }
  0xbf   :  { %452 = vmatpush.msra.mxu2 %v103_v27 }
  0xc0   :  { %2409 = vmatpush.msrb.mxu3 %v103_v27 }
  0xc1   :  { %453 = vmatpush.msra.mxu2 %v101_v26 }
  0xc2   :  { %2410 = vmatpush.msrb.mxu3 %v101_v26 }
  0xc3   :  { %454 = vmatpush.msra.mxu2 %v98_v24 }
  0xc4   :  { %2411 = vmatpush.msrb.mxu3 %v98_v24 }
  0xc5   :  { %455 = vmatpush.msra.mxu2 %v96_v23 }
  0xc6   :  { %2412 = vmatpush.msrb.mxu3 %v96_v23 }
  0xc7   :  { %456 = vmatpush.msra.mxu2 %v2808_v22 }
  0xc8   :  { %2413 = vmatpush.msrb.mxu3 %v2808_v22 }
  0xc9   :  { %457 = vmatpush.msra.mxu2 %v2804_v21 }
  0xca   :  { %2414 = vmatpush.msrb.mxu3 %v2804_v21 }
 0x100   :  { %v161_v34 = vpop.f32.mrf.mxu1 }
 0x101   :  { %193 = vrot.lane.b32.xlu0 %v161_v34, %s2670_s3  ;;  %517 = vperm.xlu1 %2438, %v161_v34  }
 0x108   :  { %v164_v35 = vpop.f32.mrf.mxu1 }
 0x109   :  { %270 = vperm.xlu2 %2439, %v164_v35   ;;  %195 = vrot.lane.b32.xlu0 %v164_v35, %s2670_s3 }
 0x10a   :  { %521 = vperm.xlu1 %2438, %v164_v35  }
 0x10f   :  { %v2425_v39 = vpop.permute.xlu1 %2424 }
 0x110   :  { %v2830_v36 = vpop.f32.mrf.mxu1  ;;  %v2426_v48 = vunpack.i.l.bf16 %v2425_v39  ;;  %v2427_v49 = vunpack.i.h.bf16 %v2425_v39 }
 0x111   :  { %525 = vperm.xlu0 %2440, %v2830_v36  }
 0x112   :  { %197 = vrot.lane.b32.xlu1 %v2830_v36, %s2670_s3 }
 0x118   :  { %v170_v37 = vpop.f32.mrf.mxu1 }
 0x11a   :  { %199 = vrot.lane.b32.xlu1 %v170_v37, %s2670_s3 }
 0x11f   :  { %v2430_v43 = vpop.permute.xlu0 %2429 }
 0x120   :  { %v173_v38 = vpop.f32.mrf.mxu1  ;;  %v2431_v45 = vunpack.i.l.bf16 %v2430_v43  ;;  %v2432_v46 = vunpack.i.h.bf16 %v2430_v43 }
 0x121   :  { %201 = vrot.lane.b32.xlu2 %v173_v38, %s2670_s3  ;;  %533 = vperm.xlu0 %2440, %v173_v38  }
 0x122   :  { %529 = vperm.xlu1 %2438, %v170_v37  }
 0x128   :  { %v2837_v40 = vpop.f32.mrf.mxu1 }
 0x129   :  { %203 = vrot.lane.b32.xlu2 %v2837_v40, %s2670_s3 }
 0x12a   :  { %537 = vperm.xlu1 %2438, %v2837_v40  }
 0x12f   :  { %v2435_v41 = vpop.permute.xlu1 %2434 }
 0x130   :  { %v2436_v42 = vunpack.i.l.bf16 %v2435_v41  ;;  %v2437_v44 = vunpack.i.h.bf16 %v2435_v41  ;;  %v2333_v41 = vunpack.c.h.bf16 %v2388_v13 }
 0x132   :  { %725 = vmatpush.msra.mxu3 %v2436_v42 }
 0x134   :  { %726 = vmatpush.msra.mxu3 %v2437_v44 }
 0x136   :  { %v179_v47 = vpop.f32.mrf.mxu3  ;;  %727 = vmatpush.msra.mxu3 %v2431_v45 }
 0x137   :  { %290 = vperm.xlu2 %2439, %v179_v47   ;;  %205 = vrot.lane.b32.xlu0 %v179_v47, %s2670_s3 }
 0x138   :  { %541 = vperm.xlu1 %2438, %v179_v47   ;;  %728 = vmatpush.msra.mxu3 %v2432_v46 }
 0x13a   :  { %729 = vmatpush.msra.mxu3 %v2426_v48  ;;  %v2321_v48 = vunpack.c.h.bf16 %v2385_v12  ;;  %v2387_v12 = vld [vmem:[%s3462_s4 + $0x30] sm:$0xff]  }
 0x13c   :  { %730 = vmatpush.msra.mxu3 %v2427_v49  ;;  %v2303_v49 = vld [vmem:[%s3462_s4] sm:$0xff]  }
 0x13e   :  { %v182_v50 = vpop.f32.mrf.mxu3 }
 0x13f   :  { %545 = vperm.xlu0 %2440, %v182_v50  }
 0x140   :  { %207 = vrot.lane.b32.xlu1 %v182_v50, %s2670_s3 }
 0x141   :  { %2441 = vset.pattern.permute.xlu1 %v2669_v33 }
 0x147   :  { %2442 = vset.pattern.permute.xlu0 %v2669_v33 }
 0x148   :  { %294 = vperm.xlu0 %2442, %v182_v50  }
 0x150   :  { %266 = vperm.xlu0 %2442, %v161_v34  }
 0x158   :  { %2444 = vrot.lane.b32.xlu0 %v2443_v51, %s2667_s0  ;;  %v2304_v51 = vunpack.c.l.bf16 %v2303_v49 }
 0x160   :  { %278 = vperm.xlu0 %2442, %v170_v37  }
 0x163   :  { %v2851_v57 = vpop.permute.xlu2 %270 }
 0x168   :  { %282 = vperm.xlu0 %2442, %v173_v38  }
 0x173   :  { %v194_v52 = vpop.permute.xlu0 %193  ;;  %v518_v53 = vpop.permute.xlu1 %517 }
 0x174   :  { %217 = vxpose.xlu2.b32.start [1/8] (short) (narrow) %v194_v52, 8  ;;  %v548_v23 = vadd.f32 %v2320_v16, %v518_v53  ;;  %v2386_v53 = vld [vmem:[%s3462_s4 + $0x28] sm:$0xff]   ;;  %v2328_v16 = vunpack.c.l.bf16 %v2387_v12 }
 0x17b   :  { %v196_v54 = vpop.permute.xlu0 %195  ;;  %v202_v59 = vpop.permute.xlu2 %201 }
 0x17c   :  { %v2849_v55 = vpop.permute.xlu1 %521  ;;  %218 = vxpose.xlu2.b32.cont [2/8] (short) (narrow) %v196_v54, 8 }
 0x17d   :  { %v549_v52 = vadd.f32 %v2321_v48, %v2849_v55 }
 0x183   :  { %v2855_v61 = vpop.permute.xlu0 %525  ;;  %v204_v62 = vpop.permute.xlu2 %203 }
 0x184   :  { %v198_v56 = vpop.permute.xlu1 %197 }
 0x185   :  { %219 = vxpose.xlu2.b32.cont [3/8] (short) (narrow) %v198_v56, 8  ;;  %v2914_v56 = vld [vmem:[%s3462_s4 + $0x10] sm:$0xff]  }
 0x18c   :  { %v200_v58 = vpop.permute.xlu1 %199 }
 0x18d   :  { %220 = vxpose.xlu2.b32.cont [4/8] (short) (narrow) %v200_v58, 8 }
 0x191   :  { %v291_v10 = vpop.permute.xlu2 %290 }
 0x192   :  { %v303_v19 = vadd.f32 %v2316_v14, %v291_v10 }
 0x193   :  { %v2857_v63 = vpop.permute.xlu0 %533 }
 0x194   :  { %v2853_v60 = vpop.permute.xlu1 %529 }
 0x195   :  { %221 = vxpose.xlu2.b32.cont [5/8] (short) (narrow) %v202_v59, 8 }
 0x19c   :  { %v2859_v0 = vpop.permute.xlu1 %537 }
 0x19d   :  { %222 = vxpose.xlu2.b32.cont [6/8] (short) (narrow) %v204_v62, 8  ;;  %v2312_v62 = vunpack.c.l.bf16 %v2914_v56 }
 0x1a9   :  { %v206_v1 = vpop.permute.xlu0 %205 }
 0x1aa   :  { %v542_v2 = vpop.permute.xlu1 %541  ;;  %223 = vxpose.xlu2.b32.cont [7/8] (short) (narrow) %v206_v1, 8 }
 0x1ab   :  { %v554_v24 = vadd.f32 %v2332_v17, %v542_v2 }
 0x1b1   :  { %v546_v3 = vpop.permute.xlu0 %545 }
 0x1b2   :  { %v208_v4 = vpop.permute.xlu1 %207  ;;  %v555_v44 = vadd.f32 %v2333_v41, %v546_v3 }
 0x1b3   :  { %224 = vxpose.xlu2.b32.end [8/8] (short) (narrow) %v208_v4, 8 }
 0x1ba   :  { %v295_v5 = vpop.permute.xlu0 %294 }
 0x1bb   :  { %v304_v20 = vadd.f32 %v2317_v15, %v295_v5 }
 0x1c2   :  { %v267_v6 = vpop.permute.xlu0 %266 }
 0x1c3   :  { %v297_v54 = vadd.f32 %v2304_v51, %v267_v6  ;;  %v2325_v6 = vunpack.c.h.bf16 %v2386_v53 }
 0x1ca   :  { %v2445_v7 = vpop.permute.xlu0 %2444 }
 0x1cb   :  { %v2446_v8 = vunpack.i.l.bf16 %v2445_v7  ;;  %v2447_v9 = vunpack.i.h.bf16 %v2445_v7 }
 0x1cd   :  { %731 = vmatpush.msra.mxu3 %v2446_v8 }
 0x1cf   :  { %732 = vmatpush.msra.mxu3 %v2447_v9 }
 0x1d2   :  { %v2904_v50 = vpop.permute.xlu0 %278 }
 0x1da   :  { %v283_v1 = vpop.permute.xlu0 %282 }
 0x1db   :  { %v301_v5 = vadd.f32 %v2312_v62, %v283_v1 }
 0x214   :  { %v233_v18 = vpop.trf.xlu2 }
 0x215   :  { %v2870_v21 = vperm.slane %v233_v18, 0  ;;  %v2872_v22 = vperm.slane %v233_v18, 1  ;;  %2464 = vset.pattern.permute.xlu2 %v2668_v29 }
 0x217   :  { %v313_v25 = vadd.f32 %v2870_v21, %v304_v20  ;;  %v312_v26 = vadd.f32 %v2870_v21, %v303_v19  ;;  %v563_v27 = vadd.f32 %v2872_v22, %v554_v24  ;;  %v557_v28 = vadd.f32 %v2872_v22, %v548_v23 }
 0x218   :  { %v2896_v47 = vadd.f32 %v2872_v22, %v555_v44  ;;  %v306_v58 = vadd.f32 %v2870_v21, %v297_v54  ;;  %v310_v9 = vadd.f32 %v2870_v21, %v301_v5  ;;  %v552_v19 = vadd.f32 %v2328_v16, %v2857_v63 }
 0x219   :  { %vm321_vm2 = vcmp.gt.f32.partialorder %v313_v25, 0.0  ;;  %v329_v30 = vmul.f32 0.2, %v313_v25  ;;  %vm320_vm3 = vcmp.gt.f32.partialorder %v312_v26, 0.0  ;;  %v328_v31 = vmul.f32 0.2, %v312_v26 }
 0x21a   :  { %v579_v38 = vmul.f32 0.2, %v563_v27  ;;  %vm571_vm4 = vcmp.gt.f32.partialorder %v563_v27, 0.0  ;;  %v573_v39 = vmul.f32 0.2, %v557_v28  ;;  %vm565_vm5 = vcmp.gt.f32.partialorder %v557_v28, 0.0 }
 0x21b   :  { %v2879_v32 = vsel %vm321_vm2, %v313_v25, %v329_v30  ;;  %v2881_v34 = vsel %vm320_vm3, %v312_v26, %v328_v31  ;;  %v322_v2 = vmul.f32 0.2, %v306_v58  ;;  %vm314_vm7 = vcmp.gt.f32.partialorder %v306_v58, 0.0 }
 0x21c   :  { %v359_v35 = vsel %vm119_vm1, %v2879_v32, -inf  ;;  %v356_v37 = vsel %vm119_vm1, %v2881_v34, -inf  ;;  %v2887_v42 = vsel %vm571_vm4, %v563_v27, %v579_v38  ;;  %v2889_v43 = vsel %vm565_vm5, %v557_v28, %v573_v39 }
 0x21d   :  { %360 = vmax.xlane.f32.xlu0 %v359_v35  ;;  %357 = vmax.xlane.f32.xlu1 %v356_v37  ;;  %v607_v45 = vsel %vm119_vm1, %v2887_v42, -inf  ;;  %v589_v46 = vsel %vm119_vm1, %v2889_v43, -inf  ;;  %v2924_v8 = vsel %vm314_vm7, %v306_v58, %v322_v2  ;;  %v326_v13 = vmul.f32 0.2, %v310_v9 }
 0x21e   :  { %v338_v11 = vsel %vm119_vm1, %v2924_v8, -inf  ;;  %vm318_vm9 = vcmp.gt.f32.partialorder %v310_v9, 0.0  ;;  %v561_v24 = vadd.f32 %v2872_v22, %v552_v19  ;;  %v2329_v25 = vunpack.c.h.bf16 %v2387_v12 }
 0x21f   :  { %v2938_v18 = vsel %vm318_vm9, %v310_v9, %v326_v13  ;;  %v2305_v31 = vunpack.c.h.bf16 %v2303_v49  ;;  %vm572_vm15 = vcmp.gt.f32.partialorder %v2896_v47, 0.0  ;;  %vm806_vm3 = vcmask 261120  }
 0x220   :  { %v350_v20 = vsel %vm119_vm1, %v2938_v18, -inf  ;;  %v577_v27 = vmul.f32 0.2, %v561_v24  ;;  %vm569_vm11 = vcmp.gt.f32.partialorder %v561_v24, 0.0  ;;  %v553_v28 = vadd.f32 %v2329_v25, %v2859_v0 }
 0x221   :  { %v298_v38 = vadd.f32 %v2305_v31, %v2851_v57 }
 0x222   :  { %v2949_v30 = vsel %vm569_vm11, %v561_v24, %v577_v27  ;;  %v562_v63 = vadd.f32 %v2872_v22, %v553_v28 }
 0x223   :  { %v601_v35 = vsel %vm119_vm1, %v2949_v30, -inf  ;;  %v307_v41 = vadd.f32 %v2870_v21, %v298_v38 }
 0x224   :  { %608 = vmax.xlane.f32.xlu2 %v607_v45  ;;  %v578_v37 = vmul.f32 0.2, %v562_v63  ;;  %vm570_vm12 = vcmp.gt.f32.partialorder %v562_v63, 0.0 }
 0x225   :  { %590 = vmax.xlane.f32.xlu0 %v589_v46  ;;  %v323_v44 = vmul.f32 0.2, %v307_v41  ;;  %vm315_vm13 = vcmp.gt.f32.partialorder %v307_v41, 0.0 }
 0x226   :  { %v2955_v39 = vsel %vm570_vm12, %v562_v63, %v578_v37 }
 0x227   :  { %v604_v0 = vsel %vm119_vm1, %v2955_v39, -inf }
 0x236   :  { %274 = vperm.xlu1 %2441, %v2830_v36   ;;  %v558_v36 = vadd.f32 %v2872_v22, %v549_v52 }
 0x238   :  { %v574_v59 = vmul.f32 0.2, %v558_v36  ;;  %vm566_vm6 = vcmp.gt.f32.partialorder %v558_v36, 0.0 }
 0x239   :  { %286 = vperm.xlu0 %2442, %v2837_v40   ;;  %v2324_v40 = vunpack.c.l.bf16 %v2386_v53 }
 0x23a   :  { %v2919_v3 = vsel %vm566_vm6, %v558_v36, %v574_v59 }
 0x23b   :  { %v550_v55 = vadd.f32 %v2324_v40, %v2855_v61  ;;  %v592_v7 = vsel %vm119_vm1, %v2919_v3, -inf  ;;  %v551_v61 = vadd.f32 %v2325_v6, %v2853_v60 }
 0x23d   :  { %v559_v4 = vadd.f32 %v2872_v22, %v550_v55  ;;  %v560_v15 = vadd.f32 %v2872_v22, %v551_v61  ;;  %v2960_v22 = vsel %vm315_vm13, %v307_v41, %v323_v44 }
 0x23e   :  { %2463 = vset.pattern.permute.xlu1 %v2668_v29  ;;  %v341_v45 = vsel %vm119_vm1, %v2960_v22, -inf }
 0x23f   :  { %v575_v10 = vmul.f32 0.2, %v559_v4  ;;  %vm567_vm8 = vcmp.gt.f32.partialorder %v559_v4, 0.0  ;;  %v576_v60 = vmul.f32 0.2, %v560_v15  ;;  %vm568_vm10 = vcmp.gt.f32.partialorder %v560_v15, 0.0 }
 0x241   :  { %v2933_v14 = vsel %vm567_vm8, %v559_v4, %v575_v10  ;;  %v2943_v23 = vsel %vm568_vm10, %v560_v15, %v576_v60  ;;  %v2313_v10 = vunpack.c.h.bf16 %v2914_v56 }
 0x242   :  { %v595_v17 = vsel %vm119_vm1, %v2933_v14, -inf  ;;  %v598_v26 = vsel %vm119_vm1, %v2943_v23, -inf }
 0x260   :  { %593 = vmax.xlane.f32.xlu1 %v592_v7  ;;  %v580_v7 = vmul.f32 0.2, %v2896_v47 }
 0x262   :  { %v2990_v61 = vsel %vm572_vm15, %v2896_v47, %v580_v7 }
 0x263   :  { %339 = vmax.xlane.f32.xlu0 %v338_v11  ;;  %v610_v13 = vsel %vm119_vm1, %v2990_v61, -inf }
 0x268   :  { %596 = vmax.xlane.f32.xlu1 %v595_v17 }
 0x26b   :  { %351 = vmax.xlane.f32.xlu0 %v350_v20 }
 0x270   :  { %599 = vmax.xlane.f32.xlu1 %v598_v26 }
 0x278   :  { %602 = vmax.xlane.f32.xlu1 %v601_v35 }
 0x280   :  { %605 = vmax.xlane.f32.xlu1 %v604_v0 }
 0x288   :  { %342 = vmax.xlane.f32.xlu1 %v341_v45 }
 0x290   :  { %v361_v46 = vpop.xlane.xlu0 %360  ;;  %v358_v48 = vpop.xlane.xlu1 %357 }
 0x291   :  { %v368_v57 = vsub.f32 %v2881_v34, %v358_v48  ;;  %v369_v51 = vsub.f32 %v2879_v32, %v361_v46  ;;  %v2382_v32 = vld [vmem:[%s3462_s4 + $0x8] sm:$0xff]   ;;  %s2671_s4 = smov 32  }
 0x292   :  { %v2309_v4 = vunpack.c.h.bf16 %v2382_v32 }
 0x293   :  { %v382_v49 = vmul.f32 1.442695, %v368_v57  ;;  %v384_v36 = vmul.f32 1.442695, %v369_v51 }
 0x294   :  { %v300_v9 = vadd.f32 %v2309_v4, %v2904_v50 }
 0x295   :  { %2477 = vpow2.f32 %v382_v49 }
 0x296   :  { %v309_v11 = vadd.f32 %v2870_v21, %v300_v9 }
 0x298   :  { %v591_v52 = vpop.xlane.xlu0 %590  ;;  %v325_v16 = vmul.f32 0.2, %v309_v11  ;;  %vm317_vm0 = vcmp.gt.f32.partialorder %v309_v11, 0.0 }
 0x299   :  { %v613_v53 = vsub.f32 %v2889_v43, %v591_v52  ;;  %v2308_v43 = vunpack.c.l.bf16 %v2382_v32 }
 0x29a   :  { %v2996_v60 = vsel %vm317_vm0, %v309_v11, %v325_v16 }
 0x29b   :  { %v621_v54 = vmul.f32 1.442695, %v613_v53  ;;  %v2967_v40 = vpop.eup %2477  ;;  %v347_v50 = vsel %vm119_vm1, %v2996_v60, -inf }
 0x29c   :  { %2185 = vmatmul.msk.f32.vlgmr.msrb.gmra.mxu3 %vm119_vm1, %v2967_v40 }
 0x29d   :  { %2479 = vpow2.f32 %v621_v54 }
 0x29e   :  { %2481 = vpow2.f32 %v384_v36 }
 0x2a3   :  { %v2480_v58 = vpop.eup %2479 }
 0x2a4   :  { %v2971_v59 = vpop.eup %2481  ;;  %v637_v34 = vsel %vm119_vm1, %v2480_v58, 0.0 }
 0x2a5   :  { %2186 = vmatmul.msk.f32.gmra.mxu3 %vm119_vm1, %v2971_v59  ;;  %638 = vadd.xlane.f32.xlu0 %v637_v34 }
 0x2a8   :  { %v275_v62 = vpop.permute.xlu1 %274 }
 0x2a9   :  { %v299_v55 = vadd.f32 %v2308_v43, %v275_v62 }
 0x2ab   :  { %v308_v1 = vadd.f32 %v2870_v21, %v299_v55  ;;  %v287_v12 = vpop.permute.xlu0 %286 }
 0x2ac   :  { %v302_v15 = vadd.f32 %v2313_v10, %v287_v12 }
 0x2ad   :  { %2195 = vmatmul.msk.f32.vlgmr.msra.gmra.mxu3 %vm119_vm1, %v2480_v58  ;;  %vm316_vm14 = vcmp.gt.f32.partialorder %v308_v1, 0.0  ;;  %v324_v2 = vmul.f32 0.2, %v308_v1 }
 0x2ae   :  { %v311_v17 = vadd.f32 %v2870_v21, %v302_v15 }
 0x2af   :  { %v2981_v5 = vsel %vm316_vm14, %v308_v1, %v324_v2 }
 0x2b0   :  { %v344_v6 = vsel %vm119_vm1, %v2981_v5, -inf  ;;  %v327_v47 = vmul.f32 0.2, %v311_v17  ;;  %vm319_vm2 = vcmp.gt.f32.partialorder %v311_v17, 0.0 }
 0x2b1   :  { %345 = vmax.xlane.f32.xlu1 %v344_v6 }
 0x2b2   :  { %v3000_v56 = vsel %vm319_vm2, %v311_v17, %v327_v47 }
 0x2b3   :  { %v353_v19 = vsel %vm119_vm1, %v3000_v56, -inf }
 0x2b9   :  { %611 = vmax.xlane.f32.xlu1 %v610_v13 }
 0x2c1   :  { %348 = vmax.xlane.f32.xlu1 %v347_v50 }
 0x2c9   :  { %354 = vmax.xlane.f32.xlu1 %v353_v19 }
 0x2d3   :  { %v594_v20 = vpop.xlane.xlu1 %593 }
 0x2d4   :  { %v614_v24 = vsub.f32 %v2919_v3, %v594_v20 }
 0x2d6   :  { %v623_v25 = vmul.f32 1.442695, %v614_v24  ;;  %v340_v26 = vpop.xlane.xlu0 %339 }
 0x2d7   :  { %v362_v21 = vsub.f32 %v2924_v8, %v340_v26 }
 0x2d8   :  { %2483 = vpow2.f32 %v623_v25 }
 0x2d9   :  { %v370_v27 = vmul.f32 1.442695, %v362_v21 }
 0x2db   :  { %2485 = vpow2.f32 %v370_v27  ;;  %v597_v28 = vpop.xlane.xlu1 %596 }
 0x2dc   :  { %v615_v63 = vsub.f32 %v2933_v14, %v597_v28 }
 0x2de   :  { %v2484_v31 = vpop.eup %2483  ;;  %v625_v35 = vmul.f32 1.442695, %v615_v63  ;;  %v352_v32 = vpop.xlane.xlu0 %351 }
 0x2df   :  { %2196 = vmatmul.msk.f32.gmra.mxu3 %vm119_vm1, %v2484_v31  ;;  %v640_v37 = vsel %vm119_vm1, %v2484_v31, 0.0 }
 0x2e0   :  { %2487 = vpow2.f32 %v625_v35  ;;  %641 = vadd.xlane.f32.xlu1 %v640_v37 }
 0x2e1   :  { %v2486_v38 = vpop.eup %2485 }
 0x2e2   :  { %2179 = vmatmul.msk.f32.vlgmr.msra.gmra.mxu2 %vm119_vm1, %v2486_v38  ;;  %v386_v54 = vsel %vm119_vm1, %v2486_v38, 0.0 }
 0x2e3   :  { %v600_v3 = vpop.xlane.xlu1 %599 }
 0x2e4   :  { %v616_v8 = vsub.f32 %v2943_v23, %v600_v3  ;;  %v609_v23 = vpop.xlane.xlu2 %608 }
 0x2e5   :  { %v619_v53 = vsub.f32 %v2887_v42, %v609_v23 }
 0x2e6   :  { %v2488_v41 = vpop.eup %2487  ;;  %v627_v0 = vmul.f32 1.442695, %v616_v8 }
 0x2e7   :  { %2197 = vmatmul.msk.f32.gmra.mxu3 %vm119_vm1, %v2488_v41  ;;  %v643_v14 = vsel %vm119_vm1, %v2488_v41, 0.0  ;;  %v633_v58 = vmul.f32 1.442695, %v619_v53  ;;  %v407_v41 = vsel %vm119_vm1, %v2971_v59, 0.0 }
 0x2e8   :  { %2489 = vpow2.f32 %v627_v0  ;;  %644 = vadd.xlane.f32.xlu0 %v643_v14 }
 0x2eb   :  { %v603_v44 = vpop.xlane.xlu1 %602 }
 0x2ec   :  { %v617_v45 = vsub.f32 %v2949_v30, %v603_v44 }
 0x2ee   :  { %v2490_v46 = vpop.eup %2489  ;;  %v629_v48 = vmul.f32 1.442695, %v617_v45 }
 0x2ef   :  { %2198 = vmatmul.msk.f32.gmra.mxu3 %vm119_vm1, %v2490_v46  ;;  %v646_v57 = vsel %vm119_vm1, %v2490_v46, 0.0 }
 0x2f0   :  { %2491 = vpow2.f32 %v629_v48  ;;  %647 = vadd.xlane.f32.xlu2 %v646_v57 }
 0x2f3   :  { %v606_v49 = vpop.xlane.xlu1 %605 }
 0x2f4   :  { %v618_v51 = vsub.f32 %v2955_v39, %v606_v49  ;;  %v366_v39 = vsub.f32 %v2938_v18, %v352_v32 }
 0x2f6   :  { %v2492_v52 = vpop.eup %2491  ;;  %v631_v36 = vmul.f32 1.442695, %v618_v51  ;;  %v378_v1 = vmul.f32 1.442695, %v366_v39 }
 0x2f7   :  { %2199 = vmatmul.msk.f32.gmra.mxu3 %vm119_vm1, %v2492_v52  ;;  %v649_v30 = vsel %vm119_vm1, %v2492_v52, 0.0 }
 0x2f8   :  { %2493 = vpow2.f32 %v631_v36  ;;  %650 = vadd.xlane.f32.xlu1 %v649_v30  ;;  %387 = vadd.xlane.f32.xlu2 %v386_v54 }
 0x2f9   :  { %2495 = vpow2.f32 %v633_v58 }
 0x2fb   :  { %v343_v34 = vpop.xlane.xlu1 %342 }
 0x2fc   :  { %v363_v43 = vsub.f32 %v2960_v22, %v343_v34 }
 0x2fe   :  { %v2494_v62 = vpop.eup %2493  ;;  %v372_v42 = vmul.f32 1.442695, %v363_v43 }
 0x2ff   :  { %2200 = vmatmul.msk.f32.gmra.mxu3 %vm119_vm1, %v2494_v62  ;;  %v652_v55 = vsel %vm119_vm1, %v2494_v62, 0.0  ;;  %v2496_v2 = vpop.eup %2495 }
 0x300   :  { %2497 = vpow2.f32 %v372_v42  ;;  %653 = vadd.xlane.f32.xlu0 %v652_v55  ;;  %v655_v6 = vsel %vm119_vm1, %v2496_v2, 0.0 }
 0x301   :  { %2499 = vpow2.f32 %v378_v1 }
 0x306   :  { %v2498_v4 = vpop.eup %2497 }
 0x307   :  { %2180 = vmatmul.msk.f32.gmra.mxu2 %vm119_vm1, %v2498_v4  ;;  %2201 = vmatmul.msk.f32.gmra.mxu3 %vm119_vm1, %v2496_v2  ;;  %v389_v22 = vsel %vm119_vm1, %v2498_v4, 0.0  ;;  %v2500_v18 = vpop.eup %2499  ;;  %v404_v4 = vsel %vm119_vm1, %v2967_v40, 0.0 }
 0x308   :  { %390 = vadd.xlane.f32.xlu1 %v389_v22  ;;  %656 = vadd.xlane.f32.xlu0 %v655_v6  ;;  %v398_v7 = vsel %vm119_vm1, %v2500_v18, 0.0 }
 0x310   :  { %399 = vadd.xlane.f32.xlu1 %v398_v7 }
 0x318   :  { %v639_v10 = vpop.xlane.xlu0 %638 }
 0x319   :  { %v661_v13 = vadd.f32 1e-16, %v639_v10 }
 0x31f   :  { %v3030_v9 = vpop.f32.mrf.mxu3 }
 0x324   :  { %v346_v11 = vpop.xlane.xlu1 %345 }
 0x325   :  { %v364_v12 = vsub.f32 %v2981_v5, %v346_v11  ;;  %v2297_v11 = vld [vmem:[%s3464_s6 + $0x18] sm:$0xff] }
 0x326   :  { %887 = vmatpush.bf16.msrb.mxu0 %v2297_v11 }
 0x327   :  { %v374_v15 = vmul.f32 1.442695, %v364_v12  ;;  %v2296_v12 = vld [vmem:[%s3464_s6 + $0x10] sm:$0xff] }
 0x328   :  { %v3033_v16 = vpop.f32.mrf.mxu3 }
 0x329   :  { %2501 = vpow2.f32 %v374_v15 }
 0x32a   :  { %2503 = vrcp.f32 %v661_v13  ;;  %888 = vmatpush.bf16.msrb.mxu0 %v2296_v12  ;;  %v916_v12 = vld [vmem:[%s3465_s7 + $0x20] sm:$0xff] }
 0x32c   :  { %v612_v17 = vpop.xlane.xlu1 %611 }
 0x32d   :  { %v620_v50 = vsub.f32 %v2990_v61, %v612_v17  ;;  %v2295_v17 = vld [vmem:[%s3464_s6 + $0x8] sm:$0xff] }
 0x32e   :  { %889 = vmatpush.bf16.msrb.mxu0 %v2295_v17 }
 0x32f   :  { %v2502_v47 = vpop.eup %2501  ;;  %v635_v19 = vmul.f32 1.442695, %v620_v50 }
 0x330   :  { %v2504_v20 = vpop.eup %2503  ;;  %v734_v24 = vpop.f32.mrf.mxu3  ;;  %2181 = vmatmul.msk.f32.gmra.mxu2 %vm119_vm1, %v2502_v47  ;;  %v392_v31 = vsel %vm119_vm1, %v2502_v47, 0.0  ;;  %v2294_v47 = vld [vmem:[%s3464_s6] sm:$0xff] }
 0x331   :  { %2505 = vpow2.f32 %v635_v19  ;;  %v766_v25 = vmul.f32 %v2504_v20, %v734_v24 }
 0x332   :  { %890 = vmatpush.bf16.msrb.mxu0 %v2294_v47  ;;  %v914_v47 = vld [vmem:[%s3465_s7 + $0x10] sm:$0xff] }
 0x333   :  { %782 = vrot.lane.b32.xlu1 %v766_v25, %s2671_s4 }
 0x334   :  { %v349_v5 = vpop.xlane.xlu1 %348 }
 0x335   :  { %v365_v26 = vsub.f32 %v2996_v60, %v349_v5 }
 0x337   :  { %v2506_v21 = vpop.eup %2505  ;;  %v376_v27 = vmul.f32 1.442695, %v365_v26 }
 0x338   :  { %2202 = vmatmul.msk.f32.gmra.mxu3 %vm119_vm1, %v2506_v21  ;;  %v658_v61 = vsel %vm119_vm1, %v2506_v21, 0.0 }
 0x339   :  { %2507 = vpow2.f32 %v376_v27  ;;  %659 = vadd.xlane.f32.xlu2 %v658_v61 }
 0x33c   :  { %v355_v28 = vpop.xlane.xlu1 %354 }
 0x33d   :  { %v367_v35 = vsub.f32 %v3000_v56, %v355_v28  ;;  %v3074_v28 = vld [vmem:[%s3463_s5] ss:$0 sm:$0xff] }
 0x33f   :  { %v2508_v63 = vpop.eup %2507  ;;  %v380_v37 = vmul.f32 1.442695, %v367_v35 }
 0x340   :  { %2182 = vmatmul.msk.f32.gmra.mxu2 %vm119_vm1, %v2508_v63  ;;  %v395_v60 = vsel %vm119_vm1, %v2508_v63, 0.0 }
 0x341   :  { %393 = vadd.xlane.f32.xlu2 %v392_v31  ;;  %2509 = vpow2.f32 %v380_v37 }
 0x347   :  { %v2510_v38 = vpop.eup %2509 }
 0x348   :  { %2183 = vmatmul.msk.f32.gmra.mxu2 %vm119_vm1, %v2500_v18  ;;  %v401_v42 = vsel %vm119_vm1, %v2510_v38, 0.0 }
 0x349   :  { %396 = vadd.xlane.f32.xlu2 %v395_v60 }
 0x350   :  { %2184 = vmatmul.msk.f32.gmra.mxu2 %vm119_vm1, %v2510_v38 }
 0x353   :  { %v642_v3 = vpop.xlane.xlu1 %641 }
 0x354   :  { %v662_v8 = vadd.f32 1e-16, %v642_v3 }
 0x356   :  { %2511 = vrcp.f32 %v662_v8 }
 0x35b   :  { %v645_v0 = vpop.xlane.xlu0 %644 }
 0x35c   :  { %v663_v56 = vadd.f32 1e-16, %v645_v0  ;;  %v2512_v14 = vpop.eup %2511 }
 0x35d   :  { %408 = vadd.xlane.f32.xlu1 %v407_v41 }
 0x35e   :  { %2513 = vrcp.f32 %v663_v56 }
 0x362   :  { %v737_v44 = vpop.f32.mrf.mxu3 }
 0x363   :  { %v767_v45 = vmul.f32 %v2512_v14, %v737_v44  ;;  %v648_v46 = vpop.xlane.xlu2 %647 }
 0x364   :  { %v664_v48 = vadd.f32 1e-16, %v648_v46  ;;  %v2514_v57 = vpop.eup %2513 }
 0x365   :  { %784 = vrot.lane.b32.xlu0 %v767_v45, %s2671_s4  ;;  %v459_v24 = vpop.f32.mrf.mxu2 }
 0x366   :  { %2515 = vrcp.f32 %v664_v48 }
 0x36a   :  { %v740_v23 = vpop.f32.mrf.mxu3 }
 0x36b   :  { %v768_v49 = vmul.f32 %v2514_v57, %v740_v23  ;;  %v651_v51 = vpop.xlane.xlu1 %650  ;;  %v388_v1 = vpop.xlane.xlu2 %387 }
 0x36c   :  { %v665_v52 = vadd.f32 1e-16, %v651_v51  ;;  %v2516_v59 = vpop.eup %2515  ;;  %v410_v19 = vadd.f32 1e-16, %v388_v1 }
 0x36d   :  { %786 = vrot.lane.b32.xlu2 %v768_v49, %s2671_s4 }
 0x36e   :  { %2517 = vrcp.f32 %v665_v52 }
 0x372   :  { %v743_v53 = vpop.f32.mrf.mxu3 }
 0x373   :  { %v769_v36 = vmul.f32 %v2516_v59, %v743_v53  ;;  %v654_v30 = vpop.xlane.xlu0 %653 }
 0x374   :  { %v666_v54 = vadd.f32 1e-16, %v654_v30  ;;  %v2518_v58 = vpop.eup %2517 }
 0x375   :  { %788 = vrot.lane.b32.xlu0 %v769_v36, %s2671_s4 }
 0x376   :  { %2519 = vrcp.f32 %v666_v54 }
 0x37a   :  { %v746_v32 = vpop.f32.mrf.mxu3 }
 0x37b   :  { %v770_v34 = vmul.f32 %v2518_v58, %v746_v32  ;;  %v657_v55 = vpop.xlane.xlu0 %656  ;;  %v391_v50 = vpop.xlane.xlu1 %390 }
 0x37c   :  { %v2520_v43 = vpop.eup %2519  ;;  %v667_v2 = vadd.f32 1e-16, %v657_v55  ;;  %v411_v25 = vadd.f32 1e-16, %v391_v50 }
 0x37d   :  { %790 = vrot.lane.b32.xlu2 %v770_v34, %s2671_s4 }
 0x37e   :  { %2521 = vrcp.f32 %v667_v2  ;;  %v919_v2 = vld [vmem:[%s3465_s7 + $0x38] sm:$0xff] }
 0x37f   :  { %952 = vmatpush.msrb.mxu1 %v919_v2 }
 0x382   :  { %v749_v62 = vpop.f32.mrf.mxu3 }
 0x383   :  { %v771_v39 = vmul.f32 %v2520_v43, %v749_v62  ;;  %v400_v20 = vpop.xlane.xlu1 %399 }
 0x384   :  { %v2522_v18 = vpop.eup %2521  ;;  %v414_v34 = vadd.f32 1e-16, %v400_v20 }
 0x385   :  { %792 = vrot.lane.b32.xlu2 %v771_v39, %s2671_s4 }
 0x38a   :  { %v752_v22 = vpop.f32.mrf.mxu3  ;;  %v462_v61 = vpop.f32.mrf.mxu2 }
 0x38b   :  { %v772_v7 = vmul.f32 %v2522_v18, %v752_v22  ;;  %v917_v18 = vld [vmem:[%s3465_s7 + $0x28] sm:$0xff] }
 0x39f   :  { %402 = vadd.xlane.f32.xlu0 %v401_v42 }
 0x3a5   :  { %v783_v21 = vpop.permute.xlu1 %782 }
 0x3ac   :  { %v660_v6 = vpop.xlane.xlu2 %659 }
 0x3ad   :  { %v668_v10 = vadd.f32 1e-16, %v660_v6 }
 0x3ae   :  { %405 = vadd.xlane.f32.xlu2 %v404_v4  ;;  %v918_v4 = vld [vmem:[%s3465_s7 + $0x30] sm:$0xff] }
 0x3af   :  { %2523 = vrcp.f32 %v668_v10  ;;  %953 = vmatpush.msrb.mxu1 %v918_v4 }
 0x3b0   :  { %2525 = vrcp.f32 %v410_v19 }
 0x3b1   :  { %2527 = vrcp.f32 %v411_v25  ;;  %954 = vmatpush.msrb.mxu1 %v917_v18 }
 0x3b3   :  { %794 = vrot.lane.b32.xlu0 %v772_v7, %s2671_s4  ;;  %v465_v44 = vpop.f32.mrf.mxu2  ;;  %955 = vmatpush.msrb.mxu1 %v916_v12 }
 0x3b4   :  { %v394_v5 = vpop.xlane.xlu2 %393 }
 0x3b5   :  { %v2524_v40 = vpop.eup %2523  ;;  %v412_v35 = vadd.f32 1e-16, %v394_v5 }
 0x3b6   :  { %v2526_v26 = vpop.eup %2525 }
 0x3b7   :  { %v491_v27 = vmul.f32 %v2526_v26, %v459_v24  ;;  %v2528_v31 = vpop.eup %2527  ;;  %2529 = vrcp.f32 %v412_v35  ;;  %v913_v26 = vld [vmem:[%s3465_s7 + $0x8] sm:$0xff] }
 0x3b8   :  { %v492_v37 = vmul.f32 %v2528_v31, %v462_v61 }
 0x3b9   :  { %v807_v63 = vsel %vm806_vm3, %v491_v27, %v783_v21 }
 0x3ba   :  { %v819_v38 = vadd.f32 %v3074_v28, %v807_v63 }
 0x3bb   :  { %v755_v13 = vpop.f32.mrf.mxu3 }
 0x3bc   :  { %v773_v15 = vmul.f32 %v2524_v40, %v755_v13  ;;  %v397_v60 = vpop.xlane.xlu2 %396  ;;  %v827_v56 = vmax.f32 %v819_v38, 0.0 }
 0x3bd   :  { %v413_v41 = vadd.f32 1e-16, %v397_v60  ;;  %v2530_v46 = vpop.eup %2529 }
 0x3be   :  { %796 = vrot.lane.b32.xlu1 %v773_v15, %s2671_s4  ;;  %v493_v57 = vmul.f32 %v2530_v46, %v465_v44  ;;  %v915_v15 = vld [vmem:[%s3465_s7 + $0x18] sm:$0xff] }
 0x3bf   :  { %2531 = vrcp.f32 %v413_v41  ;;  %956 = vmatpush.msrb.mxu1 %v915_v15 }
 0x3c0   :  { %2533 = vrcp.f32 %v414_v34 }
 0x3c1   :  { %957 = vmatpush.msrb.mxu1 %v914_v47 }
 0x3c3   :  { %v468_v51 = vpop.f32.mrf.mxu2  ;;  %958 = vmatpush.msrb.mxu1 %v913_v26 }
 0x3c5   :  { %v2532_v23 = vpop.eup %2531 }
 0x3c6   :  { %v494_v52 = vmul.f32 %v2532_v23, %v468_v51  ;;  %v2534_v55 = vpop.eup %2533 }
 0x3c7   :  { %v787_v48 = vpop.permute.xlu2 %786 }
 0x3c8   :  { %v809_v49 = vsel %vm806_vm3, %v493_v57, %v787_v48 }
 0x3c9   :  { %v821_v59 = vadd.f32 %v3074_v28, %v809_v49 }
 0x3cb   :  { %v829_v54 = vmax.f32 %v821_v59, 0.0  ;;  %v471_v62 = vpop.f32.mrf.mxu2 }
 0x3cc   :  { %v495_v1 = vmul.f32 %v2534_v55, %v471_v62 }
 0x3d0   :  { %v409_v17 = vpop.xlane.xlu1 %408 }
 0x3d1   :  { %v417_v25 = vadd.f32 1e-16, %v409_v17 }
 0x3d3   :  { %v474_v10 = vpop.f32.mrf.mxu2 }
 0x3d7   :  { %v785_v3 = vpop.permute.xlu0 %784  ;;  %v791_v43 = vpop.permute.xlu2 %790 }
 0x3d8   :  { %v808_v8 = vsel %vm806_vm3, %v492_v37, %v785_v3  ;;  %v811_v6 = vsel %vm806_vm3, %v495_v1, %v791_v43 }
 0x3d9   :  { %v820_v0 = vadd.f32 %v3074_v28, %v808_v8  ;;  %v823_v40 = vadd.f32 %v3074_v28, %v811_v6 }
 0x3db   :  { %v828_v14 = vmax.f32 %v820_v0, 0.0  ;;  %v831_v19 = vmax.f32 %v823_v40, 0.0 }
 0x3dd   :  { %v835_v45 = vpack.c.bf16 %v828_v14, %v827_v56 }
 0x3df   :  { %2219 = vmatmul.msk.bf16.vlgmr.msrb.gmra.mxu0 %vm119_vm1, %v835_v45  ;;  %v793_v22 = vpop.permute.xlu2 %792 }
 0x3e7   :  { %v789_v53 = vpop.permute.xlu0 %788 }
 0x3e8   :  { %v810_v36 = vsel %vm806_vm3, %v494_v52, %v789_v53 }
 0x3e9   :  { %v822_v30 = vadd.f32 %v3074_v28, %v810_v36 }
 0x3eb   :  { %v830_v58 = vmax.f32 %v822_v30, 0.0 }
 0x3ed   :  { %v836_v32 = vpack.c.bf16 %v830_v58, %v829_v54 }
 0x3ef   :  { %2220 = vmatmul.msk.bf16.gmra.mxu0 %vm119_vm1, %v836_v32 }
 0x412   :  { %v403_v39 = vpop.xlane.xlu0 %402 }
 0x413   :  { %v415_v42 = vadd.f32 1e-16, %v403_v39 }
 0x415   :  { %2535 = vrcp.f32 %v415_v42 }
 0x41b   :  { %v2536_v7 = vpop.eup %2535 }
 0x41c   :  { %v496_v11 = vmul.f32 %v2536_v7, %v474_v10  ;;  %v3163_v7 = vld [vmem:[%s3466_s8] sm:$0xff]  }
 0x41d   :  { %v2337_v10 = vunpack.c.h.bf16 %v3163_v7 }
 0x41e   :  { %v812_v13 = vsel %vm806_vm3, %v496_v11, %v793_v22 }
 0x41f   :  { %v824_v50 = vadd.f32 %v3074_v28, %v812_v13 }
 0x421   :  { %v406_v20 = vpop.xlane.xlu2 %405  ;;  %v832_v24 = vmax.f32 %v824_v50, 0.0 }
 0x422   :  { %v416_v5 = vadd.f32 1e-16, %v406_v20 }
 0x423   :  { %v837_v21 = vpack.c.bf16 %v832_v24, %v831_v19 }
 0x424   :  { %2537 = vrcp.f32 %v416_v5 }
 0x425   :  { %2221 = vmatmul.msk.bf16.gmra.mxu0 %vm119_vm1, %v837_v21  ;;  %2539 = vrcp.f32 %v417_v25  ;;  %v795_v31 = vpop.permute.xlu0 %794 }
 0x42a   :  { %v2538_v27 = vpop.eup %2537 }
 0x42b   :  { %v497_v61 = vmul.f32 %v2538_v27, %v3030_v9  ;;  %v2540_v63 = vpop.eup %2539  ;;  %v912_v9 = vld [vmem:[%s3465_s7] sm:$0xff] }
 0x42c   :  { %v498_v37 = vmul.f32 %v2540_v63, %v3033_v16  ;;  %959 = vmatpush.msrb.mxu1 %v912_v9 }
 0x42d   :  { %v813_v35 = vsel %vm806_vm3, %v497_v61, %v795_v31  ;;  %v2389_v61 = vld [vmem:[%s3466_s8 + $0x8] sm:$0xff]  }
 0x42e   :  { %v825_v60 = vadd.f32 %v3074_v28, %v813_v35  ;;  %v2341_v63 = vunpack.c.h.bf16 %v2389_v61 }
 0x430   :  { %v797_v38 = vpop.permute.xlu1 %796  ;;  %v833_v41 = vmax.f32 %v825_v60, 0.0  ;;  %v2393_v60 = vld [vmem:[%s3466_s8 + $0x28] sm:$0xff]  }
 0x431   :  { %v814_v3 = vsel %vm806_vm3, %v498_v37, %v797_v38  ;;  %v2392_v38 = vld [vmem:[%s3466_s8 + $0x20] sm:$0xff]  }
 0x432   :  { %v826_v8 = vadd.f32 %v3074_v28, %v814_v3  ;;  %v2394_v3 = vld [vmem:[%s3466_s8 + $0x30] sm:$0xff]  }
 0x433   :  { %v2360_v9 = vunpack.c.l.bf16 %v2394_v3 }
 0x434   :  { %v834_v0 = vmax.f32 %v826_v8, 0.0  ;;  %v2352_v8 = vunpack.c.l.bf16 %v2392_v38 }
 0x436   :  { %v838_v56 = vpack.c.bf16 %v834_v0, %v833_v41  ;;  %v2357_v41 = vunpack.c.h.bf16 %v2393_v60  ;;  %v2340_v0 = vunpack.c.l.bf16 %v2389_v61  ;;  %v2390_v61 = vld [vmem:[%s3466_s8 + $0x10] sm:$0xff]  }
 0x438   :  { %2222 = vmatmul.msk.bf16.gmra.mxu0 %vm119_vm1, %v838_v56  ;;  %v2353_v56 = vunpack.c.h.bf16 %v2392_v38 }
 0x45c   :  { %v3122_v14 = vpop.f32.mrf.mxu0 }
 0x45d   :  { %2223 = vmatmul.msk.f32.vlgmr.msrb.gmra.mxu1 %vm119_vm1, %v3122_v14 }
 0x464   :  { %v3126_v16 = vpop.f32.mrf.mxu0 }
 0x465   :  { %2224 = vmatmul.msk.f32.gmra.mxu1 %vm119_vm1, %v3126_v16  ;;  %v2465_v2 = vpack.i.bf16 %v3122_v14, %v3126_v16 }
 0x46c   :  { %v897_v28 = vpop.f32.mrf.mxu0 }
 0x46d   :  { %2225 = vmatmul.msk.f32.gmra.mxu1 %vm119_vm1, %v897_v28 }
 0x474   :  { %v899_v44 = vpop.f32.mrf.mxu0 }
 0x475   :  { %v2448_v45 = vpack.i.bf16 %v897_v28, %v899_v44  ;;  %2226 = vmatmul.msk.f32.gmra.mxu1 %vm119_vm1, %v899_v44 }
 0x477   :  { %2449 = vrot.lane.b32.xlu0 %v2448_v45, %s2667_s0 }
 0x4a2   :  { %v902_v46 = vpop.f32.mrf.mxu0 }
 0x4a3   :  { %2227 = vmatmul.msk.f32.gmra.mxu1 %vm119_vm1, %v902_v46 }
 0x4aa   :  { %v904_v48 = vpop.f32.mrf.mxu0 }
 0x4ab   :  { %v2453_v57 = vpack.i.bf16 %v902_v46, %v904_v48  ;;  %2228 = vmatmul.msk.f32.gmra.mxu1 %vm119_vm1, %v904_v48 }
 0x4ad   :  { %2454 = vrot.lane.b32.xlu0 %v2453_v57, %s2667_s0 }
 0x4b5   :  { %v907_v23 = vpop.f32.mrf.mxu0 }
 0x4b6   :  { %2229 = vmatmul.msk.f32.gmra.mxu1 %vm119_vm1, %v907_v23 }
 0x4bd   :  { %v909_v49 = vpop.f32.mrf.mxu0 }
 0x4be   :  { %v2458_v51 = vpack.i.bf16 %v907_v23, %v909_v49  ;;  %2230 = vmatmul.msk.f32.gmra.mxu1 %vm119_vm1, %v909_v49  ;;  %1250 = vmatpush.msrb.mxu2 %v909_v49 }
 0x4c0   :  { %2459 = vrot.lane.b32.xlu2 %v2458_v51, %s2667_s0  ;;  %1251 = vmatpush.msrb.mxu2 %v907_v23 }
 0x4c2   :  { %1252 = vmatpush.msrb.mxu2 %v904_v48 }
 0x4c4   :  { %1253 = vmatpush.msrb.mxu2 %v902_v46 }
 0x4c6   :  { %1254 = vmatpush.msrb.mxu2 %v899_v44 }
 0x4c8   :  { %1255 = vmatpush.msrb.mxu2 %v897_v28 }
 0x4ca   :  { %1256 = vmatpush.msrb.mxu2 %v3126_v16 }
 0x4cc   :  { %1257 = vmatpush.msrb.mxu2 %v3122_v14 }
 0x4da   :  { %v961_v52 = vpop.f32.mrf.mxu1 }
 0x4db   :  { %1317 = vperm.xlu1 %2463, %v961_v52   ;;  %993 = vrot.lane.b32.xlu0 %v961_v52, %s2670_s3 }
 0x4e2   :  { %v964_v59 = vpop.f32.mrf.mxu1 }
 0x4e3   :  { %995 = vrot.lane.b32.xlu1 %v964_v59, %s2670_s3  ;;  %1066 = vperm.xlu0 %2442, %v961_v52  }
 0x4e4   :  { %1321 = vperm.xlu2 %2464, %v964_v59   ;;  %2471 = vset.pattern.permute.xlu1 %v2669_v33 }
 0x4e9   :  { %v2450_v30 = vpop.permute.xlu0 %2449 }
 0x4ea   :  { %v967_v53 = vpop.f32.mrf.mxu1  ;;  %v2451_v42 = vunpack.i.l.bf16 %v2450_v30  ;;  %v2452_v55 = vunpack.i.h.bf16 %v2450_v30 }
 0x4eb   :  { %1070 = vperm.xlu0 %2442, %v964_v59  }
 0x4ec   :  { %997 = vrot.lane.b32.xlu2 %v967_v53, %s2670_s3 }
 0x4f2   :  { %v970_v36 = vpop.f32.mrf.mxu1 }
 0x4f3   :  { %999 = vrot.lane.b32.xlu0 %v970_v36, %s2670_s3 }
 0x4f4   :  { %1329 = vperm.xlu2 %2464, %v970_v36  }
 0x51a   :  { %v2460_v54 = vpop.permute.xlu2 %2459 }
 0x51b   :  { %v2461_v58 = vunpack.i.l.bf16 %v2460_v54  ;;  %v2462_v32 = vunpack.i.h.bf16 %v2460_v54  ;;  %v2336_v54 = vunpack.c.l.bf16 %v3163_v7 }
 0x51d   :  { %1525 = vmatpush.msrb.mxu3 %v2461_v58  ;;  %v2356_v58 = vunpack.c.l.bf16 %v2393_v60  ;;  %v2345_v60 = vunpack.c.h.bf16 %v2390_v61 }
 0x51f   :  { %1526 = vmatpush.msrb.mxu3 %v2462_v32  ;;  %v2455_v34 = vpop.permute.xlu0 %2454 }
 0x520   :  { %v2456_v43 = vunpack.i.l.bf16 %v2455_v34  ;;  %v973_v62 = vpop.f32.mrf.mxu1  ;;  %v2457_v39 = vunpack.i.h.bf16 %v2455_v34 }
 0x521   :  { %1001 = vrot.lane.b32.xlu1 %v973_v62, %s2670_s3  ;;  %1333 = vperm.xlu2 %2464, %v973_v62  }
 0x522   :  { %1527 = vmatpush.msrb.mxu3 %v2456_v43 }
 0x524   :  { %1528 = vmatpush.msrb.mxu3 %v2457_v39 }
 0x526   :  { %1529 = vmatpush.msrb.mxu3 %v2451_v42 }
 0x528   :  { %v976_v1 = vpop.f32.mrf.mxu1  ;;  %1530 = vmatpush.msrb.mxu3 %v2452_v55 }
 0x529   :  { %1003 = vrot.lane.b32.xlu0 %v976_v1, %s2670_s3  ;;  %1337 = vperm.xlu2 %2464, %v976_v1  }
 0x531   :  { %2466 = vrot.lane.b32.xlu2 %v2465_v2, %s2667_s0 }
 0x532   :  { %2472 = vset.pattern.permute.xlu2 %v2669_v33 }
 0x533   :  { %v3152_v4 = vpop.f32.mrf.mxu1 }
 0x534   :  { %1005 = vrot.lane.b32.xlu1 %v3152_v4, %s2670_s3 }
 0x539   :  { %1086 = vperm.xlu2 %2472, %v976_v1  }
 0x53b   :  { %v982_v22 = vpop.f32.mrf.mxu1 }
 0x53c   :  { %1082 = vperm.xlu1 %2471, %v973_v62   ;;  %1007 = vrot.lane.b32.xlu0 %v982_v22, %s2670_s3 }
 0x53e   :  { %v1322_v40 = vpop.permute.xlu2 %1321 }
 0x53f   :  { %v1349_v48 = vadd.f32 %v2353_v56, %v1322_v40 }
 0x544   :  { %1074 = vperm.xlu0 %2442, %v967_v53  }
 0x546   :  { %v998_v13 = vpop.permute.xlu2 %997 }
 0x54c   :  { %1078 = vperm.xlu0 %2442, %v970_v36  }
 0x54d   :  { %v994_v6 = vpop.permute.xlu0 %993 }
 0x54e   :  { %v1330_v15 = vpop.permute.xlu2 %1329 }
 0x54f   :  { %v1351_v28 = vadd.f32 %v2357_v41, %v1330_v15 }
 0x554   :  { %2470 = vset.pattern.permute.xlu0 %v2668_v29  ;;  %v1318_v29 = vpop.permute.xlu1 %1317 }
 0x555   :  { %1325 = vperm.xlu0 %2470, %v967_v53   ;;  %v3158_v18 = vpop.permute.xlu0 %1066  ;;  %v1348_v14 = vadd.f32 %v2352_v8, %v1318_v29 }
 0x55c   :  { %v996_v17 = vpop.permute.xlu1 %995 }
 0x55d   :  { %1341 = vperm.xlu0 %2470, %v3152_v4   ;;  %v1071_v11 = vpop.permute.xlu0 %1070 }
 0x55e   :  { %v3167_v12 = vadd.f32 %v2337_v10, %v1071_v11 }
 0x565   :  { %1345 = vperm.xlu0 %2470, %v982_v22   ;;  %v1000_v19 = vpop.permute.xlu0 %999 }
 0x56d   :  { %2473 = vset.pattern.permute.xlu0 %v2669_v33 }
 0x56e   :  { %1094 = vperm.xlu0 %2473, %v982_v22   ;;  %v1097_v22 = vadd.f32 %v2336_v54, %v3158_v18 }
 0x571   :  { %1017 = vxpose.xlu1.b32.start [1/8] (short) (narrow) %v994_v6, 8 }
 0x579   :  { %1018 = vxpose.xlu1.b32.cont [2/8] (short) (narrow) %v996_v17, 8 }
 0x57b   :  { %v1334_v50 = vpop.permute.xlu2 %1333 }
 0x57c   :  { %v1352_v57 = vadd.f32 %v2360_v9, %v1334_v50 }
 0x581   :  { %1019 = vxpose.xlu1.b32.cont [3/8] (short) (narrow) %v998_v13, 8  ;;  %v2361_v13 = vunpack.c.h.bf16 %v2394_v3 }
 0x583   :  { %v3170_v47 = vpop.permute.xlu2 %1337 }
 0x584   :  { %v1353_v50 = vadd.f32 %v2361_v13, %v3170_v47 }
 0x589   :  { %1020 = vxpose.xlu1.b32.cont [4/8] (short) (narrow) %v1000_v19, 8  ;;  %v2395_v19 = vld [vmem:[%s3466_s8 + $0x38] sm:$0xff]  }
 0x58b   :  { %v2467_v20 = vpop.permute.xlu2 %2466 }
 0x58c   :  { %v2468_v24 = vunpack.i.l.bf16 %v2467_v20  ;;  %v2469_v25 = vunpack.i.h.bf16 %v2467_v20 }
 0x58e   :  { %1531 = vmatpush.msrb.mxu3 %v2468_v24 }
 0x590   :  { %1532 = vmatpush.msrb.mxu3 %v2469_v25 }
 0x593   :  { %v1002_v5 = vpop.permute.xlu1 %1001  ;;  %v1087_v38 = vpop.permute.xlu2 %1086 }
 0x594   :  { %1021 = vxpose.xlu1.b32.cont [5/8] (short) (narrow) %v1002_v5, 8  ;;  %v2364_v5 = vunpack.c.l.bf16 %v2395_v19  ;;  %v1102_v41 = vadd.f32 %v2345_v60, %v1087_v38 }
 0x59b   :  { %v1004_v33 = vpop.permute.xlu0 %1003 }
 0x59c   :  { %1022 = vxpose.xlu1.b32.cont [6/8] (short) (narrow) %v1004_v33, 8 }
 0x5a6   :  { %v1006_v26 = vpop.permute.xlu1 %1005 }
 0x5a7   :  { %1023 = vxpose.xlu1.b32.cont [7/8] (short) (narrow) %v1006_v26, 8 }
 0x5ae   :  { %v1008_v21 = vpop.permute.xlu0 %1007  ;;  %v3177_v37 = vpop.permute.xlu1 %1082 }
 0x5af   :  { %1024 = vxpose.xlu1.b32.end [8/8] (short) (narrow) %v1008_v21, 8 }
 0x5b6   :  { %v1075_v27 = vpop.permute.xlu0 %1074 }
 0x5b7   :  { %v1099_v44 = vadd.f32 %v2340_v0, %v1075_v27 }
 0x5be   :  { %v1079_v31 = vpop.permute.xlu0 %1078 }
 0x5bf   :  { %v3175_v35 = vadd.f32 %v2341_v63, %v1079_v31 }
 0x5c7   :  { %v1326_v43 = vpop.permute.xlu0 %1325 }
 0x5c8   :  { %v1350_v6 = vadd.f32 %v2356_v58, %v1326_v43  ;;  %v2391_v58 = vld [vmem:[%s3466_s8 + $0x18] sm:$0xff]  }
 0x5cf   :  { %v1342_v33 = vpop.permute.xlu0 %1341 }
 0x5d0   :  { %v1354_v27 = vadd.f32 %v2364_v5, %v1342_v33 }
 0x61b   :  { %v1033_v16 = vpop.trf.xlu1 }
 0x61c   :  { %v3188_v45 = vperm.slane %v1033_v16, 0  ;;  %v3190_v46 = vperm.slane %v1033_v16, 1 }
 0x61e   :  { %v1360_v23 = vadd.f32 %v3190_v46, %v1351_v28  ;;  %v1357_v49 = vadd.f32 %v3190_v46, %v1348_v14  ;;  %v1108_v51 = vadd.f32 %v3188_v45, %v1099_v44  ;;  %v1361_v52 = vadd.f32 %v3190_v46, %v1352_v57  ;;  %v1346_v57 = vpop.permute.xlu0 %1345 }
 0x61f   :  { %v1358_v59 = vadd.f32 %v3190_v46, %v1349_v48  ;;  %v1106_v11 = vadd.f32 %v3188_v45, %v1097_v22  ;;  %v1359_v40 = vadd.f32 %v3190_v46, %v1350_v6  ;;  %v1362_v25 = vadd.f32 %v3190_v46, %v1353_v50 }
 0x620   :  { %vm1368_vm4 = vcmp.gt.f32.partialorder %v1360_v23, 0.0  ;;  %v1376_v53 = vmul.f32 0.2, %v1360_v23  ;;  %vm1365_vm5 = vcmp.gt.f32.partialorder %v1357_v49, 0.0  ;;  %v1373_v36 = vmul.f32 0.2, %v1357_v49 }
 0x621   :  { %vm1116_vm6 = vcmp.gt.f32.partialorder %v1108_v51, 0.0  ;;  %v1124_v30 = vmul.f32 0.2, %v1108_v51  ;;  %v1377_v1 = vmul.f32 0.2, %v1361_v52  ;;  %vm1369_vm7 = vcmp.gt.f32.partialorder %v1361_v52, 0.0 }
 0x622   :  { %v3198_v32 = vsel %vm1368_vm4, %v1360_v23, %v1376_v53  ;;  %v3200_v34 = vsel %vm1365_vm5, %v1357_v49, %v1373_v36  ;;  %v1374_v2 = vmul.f32 0.2, %v1358_v59  ;;  %vm1366_vm8 = vcmp.gt.f32.partialorder %v1358_v59, 0.0 }
 0x623   :  { %v1398_v62 = vsel %vm119_vm1, %v3198_v32, -inf  ;;  %v1389_v39 = vsel %vm119_vm1, %v3200_v34, -inf  ;;  %v3206_v42 = vsel %vm1116_vm6, %v1108_v51, %v1124_v30  ;;  %v3211_v7 = vsel %vm1369_vm7, %v1361_v52, %v1377_v1 }
 0x624   :  { %1399 = vmax.xlane.f32.xlu0 %v1398_v62  ;;  %1390 = vmax.xlane.f32.xlu2 %v1389_v39  ;;  %v1144_v55 = vsel %vm119_vm1, %v3206_v42, -inf  ;;  %v3213_v10 = vsel %vm1366_vm8, %v1358_v59, %v1374_v2  ;;  %v1401_v29 = vsel %vm119_vm1, %v3211_v7, -inf  ;;  %v1122_v17 = vmul.f32 0.2, %v1106_v11 }
 0x625   :  { %1145 = vmax.xlane.f32.xlu1 %v1144_v55  ;;  %v1392_v15 = vsel %vm119_vm1, %v3213_v10, -inf  ;;  %v1375_v18 = vmul.f32 0.2, %v1359_v40  ;;  %vm1114_vm9 = vcmp.gt.f32.partialorder %v1106_v11, 0.0  ;;  %vm1367_vm10 = vcmp.gt.f32.partialorder %v1359_v40, 0.0 }
 0x626   :  { %v3225_v20 = vsel %vm1114_vm9, %v1106_v11, %v1122_v17  ;;  %v1378_v47 = vmul.f32 0.2, %v1362_v25  ;;  %vm1370_vm11 = vcmp.gt.f32.partialorder %v1362_v25, 0.0  ;;  %v1363_v31 = vadd.f32 %v3190_v46, %v1354_v27  ;;  %v1095_v55 = vpop.permute.xlu0 %1094 }
 0x627   :  { %v3227_v24 = vsel %vm1367_vm10, %v1359_v40, %v1375_v18  ;;  %v1138_v26 = vsel %vm119_vm1, %v3225_v20, -inf  ;;  %v1111_v56 = vadd.f32 %v3188_v45, %v1102_v41  ;;  %v1107_v44 = vadd.f32 %v3188_v45, %v3167_v12 }
 0x628   :  { %v1395_v21 = vsel %vm119_vm1, %v3227_v24, -inf  ;;  %v3237_v63 = vsel %vm1370_vm11, %v1362_v25, %v1378_v47  ;;  %v1379_v8 = vmul.f32 0.2, %v1363_v31  ;;  %vm1371_vm12 = vcmp.gt.f32.partialorder %v1363_v31, 0.0 }
 0x629   :  { %v1404_v3 = vsel %vm119_vm1, %v3237_v63, -inf  ;;  %v1127_v14 = vmul.f32 0.2, %v1111_v56  ;;  %vm1119_vm13 = vcmp.gt.f32.partialorder %v1111_v56, 0.0  ;;  %v2365_v48 = vunpack.c.h.bf16 %v2395_v19 }
 0x62a   :  { %v3242_v0 = vsel %vm1371_vm12, %v1363_v31, %v1379_v8  ;;  %v1123_v23 = vmul.f32 0.2, %v1107_v44  ;;  %vm1115_vm14 = vcmp.gt.f32.partialorder %v1107_v44, 0.0  ;;  %v1109_v12 = vadd.f32 %v3188_v45, %v3175_v35 }
 0x62b   :  { %v1407_v9 = vsel %vm119_vm1, %v3242_v0, -inf  ;;  %v3247_v16 = vsel %vm1119_vm13, %v1111_v56, %v1127_v14  ;;  %v1355_v49 = vadd.f32 %v2365_v48, %v1346_v57  ;;  %v2344_v36 = vunpack.c.l.bf16 %v2390_v61 }
 0x62c   :  { %1402 = vmax.xlane.f32.xlu0 %v1401_v29  ;;  %1393 = vmax.xlane.f32.xlu2 %v1392_v15  ;;  %v1153_v28 = vsel %vm119_vm1, %v3247_v16, -inf  ;;  %v3254_v51 = vsel %vm1115_vm14, %v1107_v44, %v1123_v23  ;;  %v1125_v54 = vmul.f32 0.2, %v1109_v12  ;;  %vm1117_vm0 = vcmp.gt.f32.partialorder %v1109_v12, 0.0 }
 0x62d   :  { %v1364_v52 = vadd.f32 %v3190_v46, %v1355_v49  ;;  %v1141_v59 = vsel %vm119_vm1, %v3254_v51, -inf  ;;  %v1101_v46 = vadd.f32 %v2344_v36, %v3177_v37  ;;  %v2349_v39 = vunpack.c.h.bf16 %v2391_v58 }
 0x62e   :  { %v3269_v43 = vsel %vm1117_vm0, %v1109_v12, %v1125_v54  ;;  %v2348_v8 = vunpack.c.l.bf16 %v2391_v58  ;;  %vm1737_vm6 = vcmask 1043456   ;;  %vm1712_vm7 = vcmask 31744  }
 0x62f   :  { %v1380_v53 = vmul.f32 0.2, %v1364_v52  ;;  %vm1372_vm15 = vcmp.gt.f32.partialorder %v1364_v52, 0.0  ;;  %v1110_v62 = vadd.f32 %v3188_v45, %v1101_v46  ;;  %v1147_v35 = vsel %vm119_vm1, %v3269_v43, -inf }
 0x630   :  { %v1104_v2 = vadd.f32 %v2349_v39, %v1095_v55 }
 0x631   :  { %v1126_v1 = vmul.f32 0.2, %v1110_v62  ;;  %vm1118_vm2 = vcmp.gt.f32.partialorder %v1110_v62, 0.0 }
 0x632   :  { %v1113_v37 = vadd.f32 %v3188_v45, %v1104_v2 }
 0x633   :  { %v3274_v22 = vsel %vm1118_vm2, %v1110_v62, %v1126_v1 }
 0x634   :  { %1139 = vmax.xlane.f32.xlu0 %v1138_v26  ;;  %1396 = vmax.xlane.f32.xlu2 %v1395_v21  ;;  %v1150_v6 = vsel %vm119_vm1, %v3274_v22, -inf  ;;  %v1129_v11 = vmul.f32 0.2, %v1113_v37  ;;  %vm1121_vm4 = vcmp.gt.f32.partialorder %v1113_v37, 0.0 }
 0x636   :  { %v3279_v40 = vsel %vm1121_vm4, %v1113_v37, %v1129_v11 }
 0x637   :  { %v1159_v13 = vsel %vm119_vm1, %v3279_v40, -inf }
 0x63c   :  { %1405 = vmax.xlane.f32.xlu0 %v1404_v3 }
 0x644   :  { %1408 = vmax.xlane.f32.xlu0 %v1407_v9 }
 0x64c   :  { %1090 = vperm.xlu2 %2472, %v3152_v4   ;;  %1154 = vmax.xlane.f32.xlu0 %v1153_v28  ;;  %v3259_v4 = vsel %vm1372_vm15, %v1364_v52, %v1380_v53  ;;  %vm2132_vm15 = vcmask 25600  }
 0x64d   :  { %v1410_v30 = vsel %vm119_vm1, %v3259_v4, -inf }
 0x675   :  { %1142 = vmax.xlane.f32.xlu2 %v1141_v59 }
 0x67d   :  { %1411 = vmax.xlane.f32.xlu2 %v1410_v30 }
 0x685   :  { %1148 = vmax.xlane.f32.xlu2 %v1147_v35 }
 0x68d   :  { %1151 = vmax.xlane.f32.xlu2 %v1150_v6 }
 0x695   :  { %1160 = vmax.xlane.f32.xlu2 %v1159_v13 }
 0x697   :  { %v1391_v29 = vpop.xlane.xlu2 %1390  ;;  %v1400_v15 = vpop.xlane.xlu0 %1399 }
 0x698   :  { %v1413_v17 = vsub.f32 %v3200_v34, %v1391_v29  ;;  %v1416_v50 = vsub.f32 %v3198_v32, %v1400_v15  ;;  %v1146_v39 = vpop.xlane.xlu1 %1145 }
 0x699   :  { %v1164_v1 = vsub.f32 %v3206_v42, %v1146_v39 }
 0x69a   :  { %v1421_v18 = vmul.f32 1.442695, %v1413_v17  ;;  %v1427_v19 = vmul.f32 1.442695, %v1416_v50 }
 0x69b   :  { %v1174_v2 = vmul.f32 1.442695, %v1164_v1 }
 0x69c   :  { %2541 = vpow2.f32 %v1421_v18 }
 0x69d   :  { %2543 = vpow2.f32 %v1427_v19 }
 0x69f   :  { %v1394_v25 = vpop.xlane.xlu2 %1393  ;;  %v1403_v5 = vpop.xlane.xlu0 %1402 }
 0x6a0   :  { %v1414_v33 = vsub.f32 %v3213_v10, %v1394_v25  ;;  %v1417_v48 = vsub.f32 %v3211_v7, %v1403_v5 }
 0x6a2   :  { %v2542_v26 = vpop.eup %2541  ;;  %v1423_v21 = vmul.f32 1.442695, %v1414_v33 }
 0x6a3   :  { %2247 = vmatmul.msk.f32.vlgmr.msrb.gmra.mxu3 %vm119_vm1, %v2542_v26  ;;  %v1437_v47 = vsel %vm119_vm1, %v2542_v26, 0.0  ;;  %v2544_v61 = vpop.eup %2543 }
 0x6a4   :  { %2545 = vpow2.f32 %v1423_v21  ;;  %1438 = vadd.xlane.f32.xlu0 %v1437_v47  ;;  %v1446_v10 = vsel %vm119_vm1, %v2544_v61, 0.0 }
 0x6a7   :  { %v1397_v27 = vpop.xlane.xlu2 %1396  ;;  %v1140_v34 = vpop.xlane.xlu0 %1139 }
 0x6a8   :  { %v1415_v32 = vsub.f32 %v3227_v24, %v1397_v27  ;;  %v1162_v31 = vsub.f32 %v3225_v20, %v1140_v34 }
 0x6aa   :  { %v2546_v60 = vpop.eup %2545  ;;  %v1425_v38 = vmul.f32 1.442695, %v1415_v32  ;;  %v1170_v3 = vmul.f32 1.442695, %v1162_v31 }
 0x6ab   :  { %2248 = vmatmul.msk.f32.gmra.mxu3 %vm119_vm1, %v2546_v60  ;;  %v1440_v30 = vsel %vm119_vm1, %v2546_v60, 0.0 }
 0x6ac   :  { %2547 = vpow2.f32 %v1425_v38  ;;  %1447 = vadd.xlane.f32.xlu0 %v1446_v10 }
 0x6ad   :  { %2549 = vpow2.f32 %v1170_v3 }
 0x6af   :  { %v1091_v41 = vpop.permute.xlu2 %1090  ;;  %v1406_v56 = vpop.xlane.xlu0 %1405 }
 0x6b0   :  { %v1103_v9 = vadd.f32 %v2348_v8, %v1091_v41  ;;  %v1418_v14 = vsub.f32 %v3237_v63, %v1406_v56 }
 0x6b2   :  { %v2548_v28 = vpop.eup %2547  ;;  %v1112_v24 = vadd.f32 %v3188_v45, %v1103_v9  ;;  %v1431_v20 = vmul.f32 1.442695, %v1418_v14  ;;  %v1429_v45 = vmul.f32 1.442695, %v1417_v48 }
 0x6b3   :  { %v2550_v44 = vpop.eup %2549  ;;  %2249 = vmatmul.msk.f32.gmra.mxu3 %vm119_vm1, %v2548_v28  ;;  %v1443_v57 = vsel %vm119_vm1, %v2548_v28, 0.0 }
 0x6b4   :  { %2551 = vpow2.f32 %v1431_v20  ;;  %2231 = vmatmul.msk.f32.vlgmr.msrb.gmra.mxu2 %vm119_vm1, %v2550_v44  ;;  %1444 = vadd.xlane.f32.xlu2 %v1443_v57  ;;  %v1186_v23 = vsel %vm119_vm1, %v2550_v44, 0.0  ;;  %vm1120_vm5 = vcmp.gt.f32.partialorder %v1112_v24, 0.0  ;;  %v1128_v49 = vmul.f32 0.2, %v1112_v24 }
 0x6b5   :  { %1187 = vadd.xlane.f32.xlu0 %v1186_v23  ;;  %2553 = vpow2.f32 %v1429_v45 }
 0x6b6   :  { %v3299_v63 = vsel %vm1120_vm5, %v1112_v24, %v1128_v49 }
 0x6b7   :  { %v1409_v52 = vpop.xlane.xlu0 %1408  ;;  %v1156_v7 = vsel %vm119_vm1, %v3299_v63, -inf }
 0x6b8   :  { %v1419_v59 = vsub.f32 %v3242_v0, %v1409_v52  ;;  %1157 = vmax.xlane.f32.xlu1 %v1156_v7 }
 0x6ba   :  { %v2552_v53 = vpop.eup %2551  ;;  %v1433_v12 = vmul.f32 1.442695, %v1419_v59 }
 0x6bb   :  { %2250 = vmatmul.msk.f32.gmra.mxu3 %vm119_vm1, %v2544_v61  ;;  %v1452_v36 = vsel %vm119_vm1, %v2552_v53, 0.0  ;;  %v2554_v54 = vpop.eup %2553 }
 0x6bc   :  { %2555 = vpow2.f32 %v1433_v12  ;;  %1453 = vadd.xlane.f32.xlu2 %v1452_v36  ;;  %v1449_v0 = vsel %vm119_vm1, %v2554_v54, 0.0 }
 0x6bf   :  { %v1155_v25 = vpop.xlane.xlu0 %1154 }
 0x6c0   :  { %1441 = vadd.xlane.f32.xlu1 %v1440_v30  ;;  %v1167_v26 = vsub.f32 %v3247_v16, %v1155_v25 }
 0x6c2   :  { %v2556_v46 = vpop.eup %2555  ;;  %v1180_v21 = vmul.f32 1.442695, %v1167_v26 }
 0x6c3   :  { %2251 = vmatmul.msk.f32.gmra.mxu3 %vm119_vm1, %v2554_v54  ;;  %v1455_v58 = vsel %vm119_vm1, %v2556_v46, 0.0 }
 0x6c4   :  { %1456 = vadd.xlane.f32.xlu2 %v1455_v58 }
 0x6c8   :  { %1450 = vadd.xlane.f32.xlu1 %v1449_v0 }
 0x6cb   :  { %2252 = vmatmul.msk.f32.gmra.mxu3 %vm119_vm1, %v2552_v53 }
 0x6d3   :  { %2253 = vmatmul.msk.f32.gmra.mxu3 %vm119_vm1, %v2556_v46 }
 0x6e8   :  { %v1143_v62 = vpop.xlane.xlu2 %1142 }
 0x6e9   :  { %v1163_v55 = vsub.f32 %v3254_v51, %v1143_v62 }
 0x6eb   :  { %v1172_v35 = vmul.f32 1.442695, %v1163_v55 }
 0x6ed   :  { %2557 = vpow2.f32 %v1172_v35 }
 0x6ee   :  { %2559 = vpow2.f32 %v1174_v2 }
 0x6f0   :  { %v1412_v37 = vpop.xlane.xlu2 %1411 }
 0x6f1   :  { %v1420_v6 = vsub.f32 %v3259_v4, %v1412_v37  ;;  %v2301_v37 = vld [vmem:[%s3468_s10 + $0x18] sm:$0xff] }
 0x6f2   :  { %1686 = vmatpush.bf16.msra.mxu0 %v2301_v37 }
 0x6f3   :  { %v2558_v11 = vpop.eup %2557  ;;  %v1435_v13 = vmul.f32 1.442695, %v1420_v6 }
 0x6f4   :  { %2232 = vmatmul.msk.f32.gmra.mxu2 %vm119_vm1, %v2558_v11  ;;  %v1189_v29 = vsel %vm119_vm1, %v2558_v11, 0.0  ;;  %v2560_v17 = vpop.eup %2559 }
 0x6f5   :  { %2561 = vpow2.f32 %v1435_v13  ;;  %1190 = vadd.xlane.f32.xlu1 %v1189_v29 }
 0x6f8   :  { %v1149_v15 = vpop.xlane.xlu2 %1148 }
 0x6f9   :  { %v1165_v51 = vsub.f32 %v3269_v43, %v1149_v15  ;;  %v1192_v43 = vsel %vm119_vm1, %v2560_v17, 0.0 }
 0x6fb   :  { %v2562_v18 = vpop.eup %2561  ;;  %v1176_v42 = vmul.f32 1.442695, %v1165_v51  ;;  %v2300_v51 = vld [vmem:[%s3468_s10 + $0x10] sm:$0xff] }
 0x6fc   :  { %2233 = vmatmul.msk.f32.gmra.mxu2 %vm119_vm1, %v2560_v17  ;;  %2254 = vmatmul.msk.f32.gmra.mxu3 %vm119_vm1, %v2562_v18  ;;  %v1458_v4 = vsel %vm119_vm1, %v2562_v18, 0.0 }
 0x6fd   :  { %2563 = vpow2.f32 %v1176_v42  ;;  %1459 = vadd.xlane.f32.xlu0 %v1458_v4  ;;  %1687 = vmatpush.bf16.msra.mxu0 %v2300_v51 }
 0x700   :  { %v1152_v50 = vpop.xlane.xlu2 %1151 }
 0x701   :  { %v1166_v19 = vsub.f32 %v3274_v22, %v1152_v50 }
 0x703   :  { %v2564_v5 = vpop.eup %2563  ;;  %v1178_v33 = vmul.f32 1.442695, %v1166_v19  ;;  %v2299_v19 = vld [vmem:[%s3468_s10 + $0x8] sm:$0xff] }
 0x704   :  { %2234 = vmatmul.msk.f32.gmra.mxu2 %vm119_vm1, %v2564_v5  ;;  %v1195_v27 = vsel %vm119_vm1, %v2564_v5, 0.0  ;;  %1688 = vmatpush.bf16.msra.mxu0 %v2299_v19  ;;  %v2298_v5 = vld [vmem:[%s3468_s10] sm:$0xff] }
 0x705   :  { %2565 = vpow2.f32 %v1178_v33  ;;  %1193 = vadd.xlane.f32.xlu0 %v1192_v43 }
 0x706   :  { %2567 = vpow2.f32 %v1180_v21 }
 0x708   :  { %v1161_v31 = vpop.xlane.xlu2 %1160  ;;  %1689 = vmatpush.bf16.msra.mxu0 %v2298_v5 }
 0x709   :  { %v1169_v14 = vsub.f32 %v3279_v40, %v1161_v31 }
 0x70b   :  { %v2566_v47 = vpop.eup %2565  ;;  %v1184_v24 = vmul.f32 1.442695, %v1169_v14 }
 0x70c   :  { %2235 = vmatmul.msk.f32.gmra.mxu2 %vm119_vm1, %v2566_v47  ;;  %v1198_v34 = vsel %vm119_vm1, %v2566_v47, 0.0  ;;  %v2568_v22 = vpop.eup %2567 }
 0x70d   :  { %1196 = vadd.xlane.f32.xlu0 %v1195_v27  ;;  %1199 = vadd.xlane.f32.xlu2 %v1198_v34  ;;  %v1201_v2 = vsel %vm119_vm1, %v2568_v22, 0.0 }
 0x714   :  { %2236 = vmatmul.msk.f32.gmra.mxu2 %vm119_vm1, %v2568_v22  ;;  %v3359_v22 = vld [vmem:[%s3467_s9] ss:$0 sm:$0xff] }
 0x717   :  { %v1439_v61 = vpop.xlane.xlu0 %1438 }
 0x718   :  { %v1461_v32 = vadd.f32 1e-16, %v1439_v61 }
 0x71a   :  { %2569 = vrcp.f32 %v1461_v32 }
 0x71f   :  { %v1448_v28 = vpop.xlane.xlu0 %1447 }
 0x720   :  { %v2570_v16 = vpop.eup %2569  ;;  %v1464_v44 = vadd.f32 1e-16, %v1448_v28 }
 0x726   :  { %v1534_v60 = vpop.f32.mrf.mxu3 }
 0x727   :  { %v1566_v38 = vmul.f32 %v2570_v16, %v1534_v60  ;;  %v1445_v3 = vpop.xlane.xlu2 %1444 }
 0x728   :  { %v1463_v10 = vadd.f32 1e-16, %v1445_v3  ;;  %v1188_v1 = vpop.xlane.xlu0 %1187 }
 0x729   :  { %1582 = vrot.lane.b32.xlu1 %v1566_v38, %s2671_s4  ;;  %v1210_v21 = vadd.f32 1e-16, %v1188_v1 }
 0x72a   :  { %2571 = vrcp.f32 %v1463_v10 }
 0x72b   :  { %v1158_v8 = vpop.xlane.xlu1 %1157 }
 0x72c   :  { %v1168_v41 = vsub.f32 %v3299_v63, %v1158_v8 }
 0x72e   :  { %v1182_v56 = vmul.f32 1.442695, %v1168_v41  ;;  %v1537_v9 = vpop.f32.mrf.mxu3 }
 0x72f   :  { %v1454_v30 = vpop.xlane.xlu2 %1453 }
 0x730   :  { %2573 = vpow2.f32 %v1182_v56  ;;  %v2572_v57 = vpop.eup %2571  ;;  %v1466_v54 = vadd.f32 1e-16, %v1454_v30 }
 0x733   :  { %v1442_v20 = vpop.xlane.xlu1 %1441 }
 0x734   :  { %v1462_v48 = vadd.f32 1e-16, %v1442_v20 }
 0x736   :  { %v2574_v23 = vpop.eup %2573  ;;  %2575 = vrcp.f32 %v1462_v48  ;;  %v1540_v49 = vpop.f32.mrf.mxu3 }
 0x737   :  { %2577 = vpow2.f32 %v1184_v24  ;;  %v1568_v45 = vmul.f32 %v2572_v57, %v1540_v49  ;;  %2237 = vmatmul.msk.f32.gmra.mxu2 %vm119_vm1, %v2574_v23  ;;  %v1457_v11 = vpop.xlane.xlu2 %1456  ;;  %v1204_v17 = vsel %vm119_vm1, %v2574_v23, 0.0  ;;  %v1259_v43 = vpop.f32.mrf.mxu2 }
 0x738   :  { %2579 = vrcp.f32 %v1464_v44  ;;  %v1467_v29 = vadd.f32 1e-16, %v1457_v11 }
 0x739   :  { %1586 = vrot.lane.b32.xlu0 %v1568_v45, %s2671_s4 }
 0x73b   :  { %v1451_v63 = vpop.xlane.xlu1 %1450 }
 0x73c   :  { %v2576_v40 = vpop.eup %2575  ;;  %v1465_v52 = vadd.f32 1e-16, %v1451_v63 }
 0x73d   :  { %v2578_v7 = vpop.eup %2577  ;;  %v1567_v59 = vmul.f32 %v2576_v40, %v1537_v9 }
 0x73e   :  { %v2580_v53 = vpop.eup %2579  ;;  %v1543_v12 = vpop.f32.mrf.mxu3  ;;  %2581 = vrcp.f32 %v1465_v52  ;;  %v1207_v35 = vsel %vm119_vm1, %v2578_v7, 0.0 }
 0x73f   :  { %v1569_v36 = vmul.f32 %v2580_v53, %v1543_v12  ;;  %2238 = vmatmul.msk.f32.gmra.mxu2 %vm119_vm1, %v2578_v7  ;;  %1584 = vrot.lane.b32.xlu2 %v1567_v59, %s2671_s4  ;;  %2583 = vrcp.f32 %v1466_v54 }
 0x741   :  { %1588 = vrot.lane.b32.xlu1 %v1569_v36, %s2671_s4 }
 0x744   :  { %v2582_v46 = vpop.eup %2581 }
 0x745   :  { %v2584_v62 = vpop.eup %2583 }
 0x746   :  { %v1546_v58 = vpop.f32.mrf.mxu3 }
 0x747   :  { %v1570_v0 = vmul.f32 %v2582_v46, %v1546_v58 }
 0x749   :  { %1590 = vrot.lane.b32.xlu0 %v1570_v0, %s2671_s4 }
 0x74e   :  { %v1549_v39 = vpop.f32.mrf.mxu3 }
 0x74f   :  { %v1571_v55 = vmul.f32 %v2584_v62, %v1549_v39 }
 0x751   :  { %1592 = vrot.lane.b32.xlu0 %v1571_v55, %s2671_s4 }
 0x756   :  { %v1552_v15 = vpop.f32.mrf.mxu3 }
 0x768   :  { %1208 = vadd.xlane.f32.xlu2 %v1207_v35  ;;  %v1191_v33 = vpop.xlane.xlu1 %1190 }
 0x769   :  { %v1211_v26 = vadd.f32 1e-16, %v1191_v33 }
 0x76b   :  { %1202 = vadd.xlane.f32.xlu1 %v1201_v2 }
 0x770   :  { %v1460_v6 = vpop.xlane.xlu0 %1459 }
 0x771   :  { %v1468_v13 = vadd.f32 1e-16, %v1460_v6 }
 0x773   :  { %2585 = vrcp.f32 %v1468_v13 }
 0x774   :  { %2587 = vrcp.f32 %v1467_v29 }
 0x775   :  { %2589 = vrcp.f32 %v1211_v26 }
 0x776   :  { %2591 = vrcp.f32 %v1210_v21 }
 0x777   :  { %v1262_v27 = vpop.f32.mrf.mxu2 }
 0x778   :  { %v1194_v32 = vpop.xlane.xlu0 %1193 }
 0x779   :  { %v2586_v18 = vpop.eup %2585  ;;  %v1212_v14 = vadd.f32 1e-16, %v1194_v32 }
 0x77a   :  { %v2588_v50 = vpop.eup %2587 }
 0x77b   :  { %1205 = vadd.xlane.f32.xlu0 %v1204_v17  ;;  %v1572_v25 = vmul.f32 %v2588_v50, %v1552_v15  ;;  %v2590_v34 = vpop.eup %2589  ;;  %2593 = vrcp.f32 %v1212_v14 }
 0x77c   :  { %v1292_v61 = vmul.f32 %v2590_v34, %v1262_v27  ;;  %v2592_v31 = vpop.eup %2591 }
 0x77d   :  { %v1291_v60 = vmul.f32 %v2592_v31, %v1259_v43 }
 0x77f   :  { %v1555_v42 = vpop.f32.mrf.mxu3  ;;  %v1265_v44 = vpop.f32.mrf.mxu2 }
 0x780   :  { %v1573_v4 = vmul.f32 %v2586_v18, %v1555_v42  ;;  %v1200_v47 = vpop.xlane.xlu2 %1199  ;;  %v1197_v24 = vpop.xlane.xlu0 %1196 }
 0x781   :  { %v1213_v20 = vadd.f32 1e-16, %v1197_v24  ;;  %v2594_v48 = vpop.eup %2593  ;;  %v1214_v46 = vadd.f32 1e-16, %v1200_v47 }
 0x782   :  { %1596 = vrot.lane.b32.xlu2 %v1573_v4, %s2671_s4  ;;  %v1293_v23 = vmul.f32 %v2594_v48, %v1265_v44 }
 0x783   :  { %2595 = vrcp.f32 %v1213_v20 }
 0x784   :  { %1594 = vrot.lane.b32.xlu1 %v1572_v25, %s2671_s4  ;;  %2597 = vrcp.f32 %v1214_v46  ;;  %v2367_v46 = vld [vmem:[%s3470_s12] sm:$0xff]  }
 0x787   :  { %v1268_v63 = vpop.f32.mrf.mxu2 }
 0x789   :  { %v2596_v49 = vpop.eup %2595 }
 0x78a   :  { %v1294_v40 = vmul.f32 %v2596_v49, %v1268_v63  ;;  %v2598_v35 = vpop.eup %2597 }
 0x78f   :  { %v1271_v54 = vpop.f32.mrf.mxu2 }
 0x790   :  { %v1295_v1 = vmul.f32 %v2598_v35, %v1271_v54 }
 0x797   :  { %v1274_v62 = vpop.f32.mrf.mxu2 }
 0x799   :  { %v1585_v16 = vpop.permute.xlu2 %1584 }
 0x79a   :  { %v1607_v38 = vsel %vm806_vm3, %v1292_v61, %v1585_v16 }
 0x79b   :  { %v1619_v3 = vadd.f32 %v3359_v22, %v1607_v38  ;;  %v1583_v10 = vpop.permute.xlu1 %1582  ;;  %v1711_v38 = vld [vmem:[%s3469_s11] sm:$0xf]  ;;  %s2672_s11 = smov 127  }
 0x79c   :  { %v1606_v8 = vsel %vm806_vm3, %v1291_v60, %v1583_v10  ;;  %2275 = vmatpush.msk.msra.mxu1 %vm1737_vm6, %v1711_v38 }
 0x79d   :  { %v1618_v41 = vadd.f32 %v3359_v22, %v1606_v8  ;;  %v1627_v56 = vmax.f32 %v1619_v3, 0.0 }
 0x79f   :  { %v1626_v9 = vmax.f32 %v1618_v41, 0.0 }
 0x7a1   :  { %v1634_v28 = vpack.c.bf16 %v1627_v56, %v1626_v9 }
 0x7a3   :  { %2271 = vmatmul.msk.bf16.vlgmr.msra.gmra.mxu0 %vm119_vm1, %v1634_v28 }
 0x7ab   :  { %v1587_v57 = vpop.permute.xlu0 %1586 }
 0x7ac   :  { %v1608_v45 = vsel %vm806_vm3, %v1293_v23, %v1587_v57 }
 0x7ad   :  { %v1620_v52 = vadd.f32 %v3359_v22, %v1608_v45 }
 0x7af   :  { %v1628_v12 = vmax.f32 %v1620_v52, 0.0 }
 0x7b3   :  { %v1589_v7 = vpop.permute.xlu1 %1588 }
 0x7b4   :  { %v1609_v59 = vsel %vm806_vm3, %v1294_v40, %v1589_v7 }
 0x7b5   :  { %v1621_v53 = vadd.f32 %v3359_v22, %v1609_v59 }
 0x7b7   :  { %v1629_v36 = vmax.f32 %v1621_v53, 0.0 }
 0x7b9   :  { %v1635_v30 = vpack.c.bf16 %v1629_v36, %v1628_v12 }
 0x7ba   :  { %v1277_v13 = vpop.f32.mrf.mxu2 }
 0x7bb   :  { %2272 = vmatmul.msk.bf16.gmra.mxu0 %vm119_vm1, %v1635_v30  ;;  %v1591_v58 = vpop.permute.xlu0 %1590 }
 0x7bc   :  { %v1610_v37 = vsel %vm806_vm3, %v1295_v1, %v1591_v58 }
 0x7bd   :  { %v1622_v15 = vadd.f32 %v3359_v22, %v1610_v37 }
 0x7bf   :  { %v1630_v18 = vmax.f32 %v1622_v15, 0.0 }
 0x7c2   :  { %v1280_v5 = vpop.f32.mrf.mxu2 }
 0x7c3   :  { %v1593_v6 = vpop.permute.xlu0 %1592 }
 0x7db   :  { %v1209_v55 = vpop.xlane.xlu2 %1208 }
 0x7dc   :  { %v1217_v2 = vadd.f32 1e-16, %v1209_v55 }
 0x7de   :  { %v1203_v0 = vpop.xlane.xlu1 %1202 }
 0x7df   :  { %v1215_v39 = vadd.f32 1e-16, %v1203_v0  ;;  %v2396_v0 = vld [vmem:[%s3470_s12 + $0x8] sm:$0xff]  }
 0x7e0   :  { %v2372_v55 = vunpack.c.l.bf16 %v2396_v0 }
 0x7e1   :  { %2599 = vrcp.f32 %v1215_v39  ;;  %v2369_v39 = vunpack.c.h.bf16 %v2367_v46 }
 0x7e2   :  { %2601 = vrcp.f32 %v1217_v2 }
 0x7e3   :  { %v1597_v43 = vpop.permute.xlu2 %1596 }
 0x7e7   :  { %v2600_v11 = vpop.eup %2599 }
 0x7e8   :  { %v1296_v29 = vmul.f32 %v2600_v11, %v1274_v62  ;;  %v2602_v50 = vpop.eup %2601  ;;  %v2368_v62 = vunpack.c.l.bf16 %v2367_v46 }
 0x7e9   :  { %v1298_v33 = vmul.f32 %v2602_v50, %v1280_v5 }
 0x7ea   :  { %v1611_v51 = vsel %vm806_vm3, %v1296_v29, %v1593_v6 }
 0x7eb   :  { %v1623_v17 = vadd.f32 %v3359_v22, %v1611_v51  ;;  %v1613_v26 = vsel %vm806_vm3, %v1298_v33, %v1597_v43 }
 0x7ec   :  { %v1625_v27 = vadd.f32 %v3359_v22, %v1613_v26  ;;  %v2397_v26 = vld [vmem:[%s3470_s12 + $0x10] sm:$0xff]  }
 0x7ed   :  { %v1631_v42 = vmax.f32 %v1623_v17, 0.0 }
 0x7ee   :  { %v1206_v4 = vpop.xlane.xlu0 %1205  ;;  %v1633_v31 = vmax.f32 %v1625_v27, 0.0 }
 0x7ef   :  { %v1216_v19 = vadd.f32 1e-16, %v1206_v4  ;;  %v1636_v25 = vpack.c.bf16 %v1631_v42, %v1630_v18  ;;  %v2373_v18 = vunpack.c.h.bf16 %v2396_v0 }
 0x7f1   :  { %2603 = vrcp.f32 %v1216_v19  ;;  %2273 = vmatmul.msk.bf16.gmra.mxu0 %vm119_vm1, %v1636_v25 }
 0x7f6   :  { %v1595_v34 = vpop.permute.xlu1 %1594 }
 0x7f7   :  { %v2604_v21 = vpop.eup %2603 }
 0x7f8   :  { %v1297_v47 = vmul.f32 %v2604_v21, %v1277_v13 }
 0x7fa   :  { %v1612_v61 = vsel %vm806_vm3, %v1297_v47, %v1595_v34  ;;  %v2377_v47 = vunpack.c.h.bf16 %v2397_v26 }
 0x7fb   :  { %v1624_v32 = vadd.f32 %v3359_v22, %v1612_v61 }
 0x7fd   :  { %v1632_v16 = vmax.f32 %v1624_v32, 0.0  ;;  %v2398_v32 = vld [vmem:[%s3470_s12 + $0x18] sm:$0xff]  }
 0x7ff   :  { %v1637_v60 = vpack.c.bf16 %v1633_v31, %v1632_v16 }
 0x801   :  { %2274 = vmatmul.msk.bf16.gmra.mxu0 %vm119_vm1, %v1637_v60  ;;  %v2380_v60 = vunpack.c.l.bf16 %v2398_v32 }
 0x820   :  { %v1691_v3 = vpop.f32.mrf.mxu0 }
 0x821   :  { %2276 = vmatmul.msk.f32.vlgmr.msra.gmra.mxu1 %vm1712_vm7, %v1691_v3 }
 0x828   :  { %v1693_v10 = vpop.f32.mrf.mxu0 }
 0x829   :  { %2277 = vmatmul.msk.f32.gmra.mxu1 %vm1712_vm7, %v1693_v10 }
 0x838   :  { %v1696_v8 = vpop.f32.mrf.mxu0 }
 0x839   :  { %2278 = vmatmul.msk.f32.gmra.mxu1 %vm1712_vm7, %v1696_v8 }
 0x840   :  { %v1698_v22 = vpop.f32.mrf.mxu0 }
 0x841   :  { %2279 = vmatmul.msk.f32.gmra.mxu1 %vm1712_vm7, %v1698_v22 }
 0x86e   :  { %v1701_v41 = vpop.f32.mrf.mxu0 }
 0x86f   :  { %2280 = vmatmul.msk.f32.gmra.mxu1 %vm1712_vm7, %v1701_v41 }
 0x876   :  { %v1703_v56 = vpop.f32.mrf.mxu0 }
 0x877   :  { %2281 = vmatmul.msk.f32.gmra.mxu1 %vm1712_vm7, %v1703_v56 }
 0x87e   :  { %v1706_v9 = vpop.f32.mrf.mxu0 }
 0x87f   :  { %2282 = vmatmul.msk.f32.gmra.mxu1 %vm1712_vm7, %v1706_v9 }
 0x886   :  { %v1708_v14 = vpop.f32.mrf.mxu0 }
 0x887   :  { %2283 = vmatmul.msk.f32.gmra.mxu1 %vm1712_vm7, %v1708_v14  ;;  %2047 = vmatpush.msra.mxu2 %v1708_v14 }
 0x889   :  { %2048 = vmatpush.msra.mxu2 %v1706_v9 }
 0x88b   :  { %2049 = vmatpush.msra.mxu2 %v1703_v56 }
 0x88d   :  { %2050 = vmatpush.msra.mxu2 %v1701_v41 }
 0x88f   :  { %2051 = vmatpush.msra.mxu2 %v1698_v22 }
 0x891   :  { %2052 = vmatpush.msra.mxu2 %v1696_v8 }
 0x893   :  { %2053 = vmatpush.msra.mxu2 %v1693_v10 }
 0x895   :  { %2054 = vmatpush.msra.mxu2 %v1691_v3 }
 0x89e   :  { %v1758_v28 = vpop.f32.mrf.mxu1 }
 0x89f   :  { %1790 = vrot.lane.b32.xlu2 %v1758_v28, %s2672_s11 }
 0x8a6   :  { %v1761_v24 = vpop.f32.mrf.mxu1 }
 0x8a7   :  { %1792 = vrot.lane.b32.xlu1 %v1761_v24, %s2672_s11 }
 0x8b6   :  { %v1764_v20 = vpop.f32.mrf.mxu1 }
 0x8b7   :  { %1794 = vrot.lane.b32.xlu0 %v1764_v20, %s2672_s11 }
 0x8be   :  { %v1767_v44 = vpop.f32.mrf.mxu1 }
 0x8bf   :  { %1871 = vperm.xlu0 %2473, %v1764_v20   ;;  %1796 = vrot.lane.b32.xlu2 %v1767_v44, %s2672_s11 }
 0x8ec   :  { %v1770_v48 = vpop.f32.mrf.mxu1 }
 0x8ed   :  { %1879 = vperm.xlu0 %2473, %v1770_v48   ;;  %1798 = vrot.lane.b32.xlu1 %v1770_v48, %s2672_s11 }
 0x8f4   :  { %v1773_v57 = vpop.f32.mrf.mxu1 }
 0x8f5   :  { %1800 = vrot.lane.b32.xlu2 %v1773_v57, %s2672_s11 }
 0x8f9   :  { %v1791_v45 = vpop.permute.xlu2 %1790 }
 0x8fc   :  { %v1776_v23 = vpop.f32.mrf.mxu1 }
 0x8fd   :  { %1863 = vperm.xlu2 %2472, %v1758_v28   ;;  %1802 = vrot.lane.b32.xlu1 %v1776_v23, %s2672_s11 }
 0x904   :  { %v3392_v49 = vpop.f32.mrf.mxu1 }
 0x905   :  { %1867 = vperm.xlu1 %2471, %v1761_v24   ;;  %1804 = vrot.lane.b32.xlu0 %v3392_v49, %s2672_s11  ;;  %v2376_v24 = vunpack.c.l.bf16 %v2397_v26 }
 0x90d   :  { %1875 = vperm.xlu1 %2471, %v1767_v44  }
 0x915   :  { %1883 = vperm.xlu1 %2471, %v1773_v57  }
 0x919   :  { %v1793_v63 = vpop.permute.xlu1 %1792  ;;  %v1797_v52 = vpop.permute.xlu2 %1796 }
 0x91d   :  { %1887 = vperm.xlu1 %2471, %v1776_v23  }
 0x923   :  { %1814 = vxpose.xlu2.b32.start [1/8] (short) (narrow) %v1791_v45, 8 }
 0x929   :  { %v1795_v40 = vpop.permute.xlu0 %1794 }
 0x92b   :  { %1815 = vxpose.xlu2.b32.cont [2/8] (short) (narrow) %v1793_v63, 8 }
 0x931   :  { %v1872_v59 = vpop.permute.xlu0 %1871 }
 0x932   :  { %v1896_v6 = vadd.f32 %v2372_v55, %v1872_v59 }
 0x933   :  { %1816 = vxpose.xlu2.b32.cont [3/8] (short) (narrow) %v1795_v40, 8 }
 0x93b   :  { %1817 = vxpose.xlu2.b32.cont [4/8] (short) (narrow) %v1797_v52, 8 }
 0x94f   :  { %v1801_v53 = vpop.permute.xlu2 %1800 }
 0x957   :  { %v1864_v54 = vpop.permute.xlu2 %1863 }
 0x958   :  { %v1894_v1 = vadd.f32 %v2368_v62, %v1864_v54 }
 0x95f   :  { %v1799_v7 = vpop.permute.xlu1 %1798  ;;  %v3395_v12 = vpop.permute.xlu0 %1879 }
 0x960   :  { %1818 = vxpose.xlu2.b32.cont [5/8] (short) (narrow) %v1799_v7, 8  ;;  %v1898_v20 = vadd.f32 %v2376_v24, %v3395_v12 }
 0x968   :  { %1819 = vxpose.xlu2.b32.cont [6/8] (short) (narrow) %v1801_v53, 8 }
 0x96f   :  { %v1803_v36 = vpop.permute.xlu1 %1802 }
 0x970   :  { %1820 = vxpose.xlu2.b32.cont [7/8] (short) (narrow) %v1803_v36, 8  ;;  %v2381_v36 = vunpack.c.h.bf16 %v2398_v32 }
 0x977   :  { %v1805_v30 = vpop.permute.xlu0 %1804  ;;  %v1868_v58 = vpop.permute.xlu1 %1867 }
 0x978   :  { %1821 = vxpose.xlu2.b32.end [8/8] (short) (narrow) %v1805_v30, 8  ;;  %v1895_v2 = vadd.f32 %v2369_v39, %v1868_v58 }
 0x97f   :  { %v1876_v29 = vpop.permute.xlu1 %1875 }
 0x980   :  { %v1897_v5 = vadd.f32 %v2373_v18, %v1876_v29 }
 0x987   :  { %v1884_v21 = vpop.permute.xlu1 %1883 }
 0x988   :  { %v1899_v61 = vadd.f32 %v2377_v47, %v1884_v21 }
 0x98f   :  { %v1888_v38 = vpop.permute.xlu1 %1887 }
 0x990   :  { %v1900_v8 = vadd.f32 %v2380_v60, %v1888_v38 }
 0x9d9   :  { %v1830_v35 = vpop.trf.xlu2 }
 0x9da   :  { %v3403_v37 = vperm.slane %v1830_v35, 0 }
 0x9dc   :  { %v1904_v11 = vadd.f32 %v3403_v37, %v1895_v2  ;;  %v1903_v13 = vadd.f32 %v3403_v37, %v1894_v1  ;;  %v1905_v15 = vadd.f32 %v3403_v37, %v1896_v6  ;;  %v1906_v43 = vadd.f32 %v3403_v37, %v1897_v5 }
 0x9dd   :  { %v1908_v16 = vadd.f32 %v3403_v37, %v1899_v61  ;;  %v1909_v41 = vadd.f32 %v3403_v37, %v1900_v8  ;;  %v1907_v44 = vadd.f32 %v3403_v37, %v1898_v20 }
 0x9de   :  { %vm1912_vm3 = vcmp.gt.f32.partialorder %v1904_v11, 0.0  ;;  %v1920_v51 = vmul.f32 0.2, %v1904_v11  ;;  %vm1911_vm8 = vcmp.gt.f32.partialorder %v1903_v13, 0.0  ;;  %v1919_v17 = vmul.f32 0.2, %v1903_v13 }
 0x9df   :  { %v1921_v25 = vmul.f32 0.2, %v1905_v15  ;;  %vm1913_vm9 = vcmp.gt.f32.partialorder %v1905_v15, 0.0  ;;  %v1922_v34 = vmul.f32 0.2, %v1906_v43  ;;  %vm1914_vm10 = vcmp.gt.f32.partialorder %v1906_v43, 0.0 }
 0x9e0   :  { %v1928_v42 = vsel %vm1912_vm3, %v1904_v11, %v1920_v51  ;;  %v1927_v4 = vsel %vm1911_vm8, %v1903_v13, %v1919_v17  ;;  %v1924_v10 = vmul.f32 0.2, %v1908_v16  ;;  %vm1916_vm11 = vcmp.gt.f32.partialorder %v1908_v16, 0.0 }
 0x9e1   :  { %v1938_v50 = vsel %vm119_vm1, %v1928_v42, -inf  ;;  %v1935_v19 = vsel %vm119_vm1, %v1927_v4, -inf  ;;  %v1929_v33 = vsel %vm1913_vm9, %v1905_v15, %v1921_v25  ;;  %v1930_v31 = vsel %vm1914_vm10, %v1906_v43, %v1922_v34 }
 0x9e2   :  { %1939 = vmax.xlane.f32.xlu1 %v1938_v50  ;;  %1936 = vmax.xlane.f32.xlu0 %v1935_v19  ;;  %v1941_v27 = vsel %vm119_vm1, %v1929_v33, -inf  ;;  %v1944_v3 = vsel %vm119_vm1, %v1930_v31, -inf  ;;  %v1932_v22 = vsel %vm1916_vm11, %v1908_v16, %v1924_v10  ;;  %v1925_v9 = vmul.f32 0.2, %v1909_v41 }
 0x9e3   :  { %v1950_v56 = vsel %vm119_vm1, %v1932_v22, -inf  ;;  %vm1917_vm12 = vcmp.gt.f32.partialorder %v1909_v41, 0.0  ;;  %v1923_v48 = vmul.f32 0.2, %v1907_v44  ;;  %vm1915_vm13 = vcmp.gt.f32.partialorder %v1907_v44, 0.0 }
 0x9e4   :  { %v1933_v14 = vsel %vm1917_vm12, %v1909_v41, %v1925_v9 }
 0x9e5   :  { %v1953_v28 = vsel %vm119_vm1, %v1933_v14, -inf  ;;  %v1931_v57 = vsel %vm1915_vm13, %v1907_v44, %v1923_v48 }
 0x9e6   :  { %v1947_v23 = vsel %vm119_vm1, %v1931_v57, -inf }
 0x9ea   :  { %1942 = vmax.xlane.f32.xlu1 %v1941_v27 }
 0x9f2   :  { %1945 = vmax.xlane.f32.xlu1 %v1944_v3 }
 0x9f6   :  { %1891 = vperm.xlu0 %2473, %v3392_v49  }
 0x9fa   :  { %1951 = vmax.xlane.f32.xlu1 %v1950_v56 }
 0xa02   :  { %1954 = vmax.xlane.f32.xlu1 %v1953_v28 }
 0xa20   :  { %1948 = vmax.xlane.f32.xlu0 %v1947_v23  ;;  %v2476_v23 = vld [vmem:[%s3471_s13] ss:$0 sm:$0xff] }
 0xa55   :  { %v1940_v49 = vpop.xlane.xlu1 %1939  ;;  %v1937_v45 = vpop.xlane.xlu0 %1936 }
 0xa56   :  { %v1959_v63 = vsub.f32 %v1927_v4, %v1937_v45  ;;  %v1960_v52 = vsub.f32 %v1928_v42, %v1940_v49 }
 0xa58   :  { %v1967_v40 = vmul.f32 1.442695, %v1959_v63  ;;  %v1969_v59 = vmul.f32 1.442695, %v1960_v52 }
 0xa5a   :  { %2605 = vpow2.f32 %v1967_v40 }
 0xa5b   :  { %2607 = vpow2.f32 %v1969_v59 }
 0xa5d   :  { %v1943_v7 = vpop.xlane.xlu1 %1942 }
 0xa5e   :  { %v1961_v12 = vsub.f32 %v1929_v33, %v1943_v7 }
 0xa60   :  { %v2606_v53 = vpop.eup %2605  ;;  %v1971_v30 = vmul.f32 1.442695, %v1961_v12 }
 0xa61   :  { %2284 = vmatmul.msk.f32.vlgmr.msra.gmra.mxu2 %vm119_vm1, %v2606_v53  ;;  %v2608_v58 = vpop.eup %2607  ;;  %v1983_v43 = vsel %vm119_vm1, %v2606_v53, 0.0 }
 0xa62   :  { %2609 = vpow2.f32 %v1971_v30  ;;  %v1986_v16 = vsel %vm119_vm1, %v2608_v58, 0.0 }
 0xa65   :  { %v1946_v54 = vpop.xlane.xlu1 %1945 }
 0xa66   :  { %v1962_v62 = vsub.f32 %v1930_v31, %v1946_v54 }
 0xa68   :  { %v1892_v46 = vpop.permute.xlu0 %1891  ;;  %v1973_v35 = vmul.f32 1.442695, %v1962_v62  ;;  %v2610_v6 = vpop.eup %2609 }
 0xa69   :  { %v1901_v0 = vadd.f32 %v2381_v36, %v1892_v46  ;;  %2285 = vmatmul.msk.f32.gmra.mxu2 %vm119_vm1, %v2608_v58  ;;  %v1989_v5 = vsel %vm119_vm1, %v2610_v6, 0.0 }
 0xa6a   :  { %2611 = vpow2.f32 %v1973_v35 }
 0xa6b   :  { %v1910_v39 = vadd.f32 %v3403_v37, %v1901_v0 }
 0xa6d   :  { %vm1918_vm14 = vcmp.gt.f32.partialorder %v1910_v39, 0.0  ;;  %v1926_v55 = vmul.f32 0.2, %v1910_v39  ;;  %v1952_v13 = vpop.xlane.xlu1 %1951 }
 0xa6e   :  { %v1964_v17 = vsub.f32 %v1932_v22, %v1952_v13 }
 0xa6f   :  { %v1934_v1 = vsel %vm1918_vm14, %v1910_v39, %v1926_v55 }
 0xa70   :  { %v1956_v2 = vsel %vm119_vm1, %v1934_v1, -inf  ;;  %v2612_v11 = vpop.eup %2611  ;;  %v1977_v37 = vmul.f32 1.442695, %v1964_v17 }
 0xa71   :  { %1957 = vmax.xlane.f32.xlu2 %v1956_v2  ;;  %2286 = vmatmul.msk.f32.gmra.mxu2 %vm119_vm1, %v2610_v6  ;;  %v1992_v31 = vsel %vm119_vm1, %v2612_v11, 0.0 }
 0xa75   :  { %v1955_v18 = vpop.xlane.xlu1 %1954 }
 0xa76   :  { %v1965_v50 = vsub.f32 %v1933_v14, %v1955_v18 }
 0xa78   :  { %v1979_v19 = vmul.f32 1.442695, %v1965_v50  ;;  %v2108_v50 = vld [vmem:[%s3459_s1] sm:$0x3]  ;;  %s2673_s1 = smov [#allocation2]  }
 0xa79   :  { %2287 = vmatmul.msk.f32.gmra.mxu2 %vm119_vm1, %v2612_v11  ;;  %s2152_s25 = sshll.u32 %s2673_s1, 4  ;;  %s2153_s25 = int_to_ptr.vmem [resolvable:$true] %s2152_s25 }
 0xa93   :  { %v1949_v29 = vpop.xlane.xlu0 %1948 }
 0xa94   :  { %v1963_v15 = vsub.f32 %v1931_v57, %v1949_v29 }
 0xa96   :  { %v1975_v51 = vmul.f32 1.442695, %v1963_v15 }
 0xa98   :  { %2613 = vpow2.f32 %v1975_v51 }
 0xa99   :  { %2615 = vpow2.f32 %v1977_v37 }
 0xa9a   :  { %2617 = vpow2.f32 %v1979_v19 }
 0xa9e   :  { %v2614_v42 = vpop.eup %2613 }
 0xa9f   :  { %2288 = vmatmul.msk.f32.gmra.mxu2 %vm119_vm1, %v2614_v42  ;;  %v1995_v4 = vsel %vm119_vm1, %v2614_v42, 0.0  ;;  %v2616_v25 = vpop.eup %2615 }
 0xaa0   :  { %1996 = vadd.xlane.f32.xlu0 %v1995_v4  ;;  %v2618_v33 = vpop.eup %2617  ;;  %v1998_v32 = vsel %vm119_vm1, %v2616_v25, 0.0 }
 0xaa1   :  { %v2001_v61 = vsel %vm119_vm1, %v2618_v33, 0.0 }
 0xaa7   :  { %2289 = vmatmul.msk.f32.gmra.mxu2 %vm119_vm1, %v2616_v25 }
 0xaa8   :  { %1990 = vadd.xlane.f32.xlu0 %v1989_v5 }
 0xaaf   :  { %2290 = vmatmul.msk.f32.gmra.mxu2 %vm119_vm1, %v2618_v33 }
 0xab0   :  { %1984 = vadd.xlane.f32.xlu0 %v1983_v43 }
 0xae4   :  { %v1958_v26 = vpop.xlane.xlu2 %1957  ;;  %v2056_v60 = vpop.f32.mrf.mxu2 }
 0xae5   :  { %v1966_v21 = vsub.f32 %v1934_v1, %v1958_v26 }
 0xae7   :  { %v1981_v47 = vmul.f32 1.442695, %v1966_v21 }
 0xae9   :  { %2619 = vpow2.f32 %v1981_v47 }
 0xaec   :  { %v2059_v38 = vpop.f32.mrf.mxu2 }
 0xaef   :  { %v2620_v27 = vpop.eup %2619 }
 0xaf0   :  { %2291 = vmatmul.msk.f32.gmra.mxu2 %vm119_vm1, %v2620_v27  ;;  %v2004_v34 = vsel %vm119_vm1, %v2620_v27, 0.0 }
 0xaf1   :  { %2005 = vadd.xlane.f32.xlu1 %v2004_v34 }
 0xaf4   :  { %v2062_v3 = vpop.f32.mrf.mxu2 }
 0xaf9   :  { %2002 = vadd.xlane.f32.xlu1 %v2001_v61 }
 0xafc   :  { %v2065_v10 = vpop.f32.mrf.mxu2 }
 0xb01   :  { %1999 = vadd.xlane.f32.xlu1 %v1998_v32 }
 0xb09   :  { %1993 = vadd.xlane.f32.xlu1 %v1992_v31 }
 0xb11   :  { %1987 = vadd.xlane.f32.xlu1 %v1986_v16 }
 0xb13   :  { %v1997_v9 = vpop.xlane.xlu0 %1996 }
 0xb14   :  { %v2011_v20 = vadd.f32 1e-16, %v1997_v9 }
 0xb1b   :  { %v1991_v57 = vpop.xlane.xlu0 %1990 }
 0xb1c   :  { %v2009_v53 = vadd.f32 1e-16, %v1991_v57 }
 0xb22   :  { %v2068_v8 = vpop.f32.mrf.mxu2 }
 0xb23   :  { %v1985_v58 = vpop.xlane.xlu0 %1984 }
 0xb24   :  { %v2007_v39 = vadd.f32 1e-16, %v1985_v58 }
 0xb2a   :  { %v2071_v22 = vpop.f32.mrf.mxu2 }
 0xb32   :  { %v2074_v14 = vpop.f32.mrf.mxu2 }
 0xb64   :  { %v2006_v41 = vpop.xlane.xlu1 %2005 }
 0xb65   :  { %v2014_v56 = vadd.f32 1e-16, %v2006_v41 }
 0xb67   :  { %2621 = vrcp.f32 %v2014_v56 }
 0xb6c   :  { %v2003_v28 = vpop.xlane.xlu1 %2002 }
 0xb6d   :  { %v2013_v24 = vadd.f32 1e-16, %v2003_v28  ;;  %v2622_v44 = vpop.eup %2621 }
 0xb6f   :  { %2623 = vrcp.f32 %v2013_v24 }
 0xb70   :  { %2625 = vrcp.f32 %v2011_v20 }
 0xb73   :  { %v2077_v48 = vpop.f32.mrf.mxu2 }
 0xb74   :  { %v2095_v49 = vmul.f32 %v2622_v44, %v2077_v48  ;;  %v2000_v45 = vpop.xlane.xlu1 %1999 }
 0xb75   :  { %v2624_v63 = vpop.eup %2623  ;;  %v2012_v40 = vadd.f32 1e-16, %v2000_v45 }
 0xb76   :  { %v2107_v52 = vadd.f32 %v2476_v23, %v2095_v49  ;;  %v2094_v7 = vmul.f32 %v2624_v63, %v2074_v14  ;;  %v2626_v12 = vpop.eup %2625 }
 0xb77   :  { %2627 = vrcp.f32 %v2012_v40  ;;  %v2092_v46 = vmul.f32 %v2626_v12, %v2068_v8 }
 0xb78   :  { %2120 = vmatpush.msra.mxu3 %v2107_v52  ;;  %v2106_v59 = vadd.f32 %v2476_v23, %v2094_v7  ;;  %2629 = vrcp.f32 %v2009_v53 }
 0xb79   :  { %v2104_v55 = vadd.f32 %v2476_v23, %v2092_v46 }
 0xb7a   :  { %2121 = vmatpush.msra.mxu3 %v2106_v59 }
 0xb7c   :  { %v1994_v36 = vpop.xlane.xlu1 %1993 }
 0xb7d   :  { %v2628_v30 = vpop.eup %2627  ;;  %v2010_v54 = vadd.f32 1e-16, %v1994_v36 }
 0xb7e   :  { %v2093_v0 = vmul.f32 %v2628_v30, %v2071_v22  ;;  %v2630_v35 = vpop.eup %2629 }
 0xb7f   :  { %2631 = vrcp.f32 %v2010_v54  ;;  %v2090_v13 = vmul.f32 %v2630_v35, %v2062_v3 }
 0xb80   :  { %v2105_v62 = vadd.f32 %v2476_v23, %v2093_v0  ;;  %2633 = vrcp.f32 %v2007_v39 }
 0xb81   :  { %v2102_v15 = vadd.f32 %v2476_v23, %v2090_v13 }
 0xb82   :  { %2122 = vmatpush.msra.mxu3 %v2105_v62 }
 0xb84   :  { %v1988_v1 = vpop.xlane.xlu1 %1987  ;;  %2123 = vmatpush.msra.mxu3 %v2104_v55 }
 0xb85   :  { %v2632_v2 = vpop.eup %2631  ;;  %v2008_v6 = vadd.f32 1e-16, %v1988_v1 }
 0xb86   :  { %v2091_v11 = vmul.f32 %v2632_v2, %v2065_v10  ;;  %v2634_v51 = vpop.eup %2633 }
 0xb87   :  { %2635 = vrcp.f32 %v2008_v6  ;;  %v2088_v18 = vmul.f32 %v2634_v51, %v2056_v60 }
 0xb88   :  { %v2103_v29 = vadd.f32 %v2476_v23, %v2091_v11 }
 0xb89   :  { %v2100_v4 = vadd.f32 %v2476_v23, %v2088_v18 }
 0xb8a   :  { %2124 = vmatpush.msra.mxu3 %v2103_v29 }
 0xb8c   :  { %2125 = vmatpush.msra.mxu3 %v2102_v15 }
 0xb8d   :  { %v2636_v17 = vpop.eup %2635 }
 0xb8e   :  { %v2089_v37 = vmul.f32 %v2636_v17, %v2059_v38 }
 0xb90   :  { %v2101_v42 = vadd.f32 %v2476_v23, %v2089_v37 }
 0xb92   :  { %2126 = vmatpush.msra.mxu3 %v2101_v42 }
 0xb94   :  { %2127 = vmatpush.msra.mxu3 %v2100_v4 }
 0xb95   :  { %2292 = vmatmul.msk.f32.vlgmr.msra.gmra.mxu3 %vm119_vm1, %v2108_v50 }
 0xc18   :  { %v2129_v19 = vpop.f32.mrf.mxu3 }
 0xc19   :  { %v2133_v25 = vsel %vm2132_vm15, %v2129_v19, -inf }
 0xc1a   :  { %2134 = vmax.xlane.f32.xlu1 %v2133_v25 }
 0xc8d   :  { %v2135_v5 = vpop.xlane.xlu1 %2134 }
 0xc8e   :  { %v2136_v33 = vsub.f32 %v2129_v19, %v2135_v5 }
 0xc90   :  { %v2137_v43 = vmul.f32 1.442695, %v2136_v33 }
 0xc92   :  { %2637 = vpow2.f32 %v2137_v43 }
 0xc98   :  { %v2638_v26 = vpop.eup %2637 }
 0xc99   :  { %v2139_v21 = vsel %vm2132_vm15, %v2638_v26, 0.0 }
 0xc9a   :  { %2140 = vadd.xlane.f32.xlu0 %v2139_v21 }
 0xd0d   :  { %v2141_v47 = vpop.xlane.xlu0 %2140 }
 0xd0e   :  { %2639 = vlog2.f32 %v2141_v47 }
 0xd14   :  { %v2640_v27 = vpop.eup %2639 }
 0xd15   :  { %v2143_v34 = vmul.f32 0.6931472, %v2640_v27 }
 0xd17   :  { %v2144_v61 = vadd.f32 %v2143_v34, %v2135_v5 }
 0xd19   :  { %v2145_v32 = vsub.f32 %v2129_v19, %v2144_v61 }
 0xd1b   :  { %2146 = vst.msk [vmem:[#allocation2] sm:$0x3] %vm2132_vm15, %v2145_v32 }
 0xd1c   :  { %2157 = dma.vmem_to_hbm [thread:$0]  %s2153_s25, 32, %s2155_s28, [#allocation3]  }
 0xd1d   :  { %2665 = dma.done.wait [#allocation3], 32  }
 0xd1e   :  { %2666 = vsyncadd [#allocation3], 4294967264 }
 0xd1f   :  { %2162 = vsyncpa [#allocation3], 1 }

</bundles_post_ra>
